<compile_context>
chip_gen: v7x
topology: tpu7x:2x2x1
jax: 0.10.0
libtpu: 0.0.40
codegen_flags: <defaults>
</compile_context>

<pallas_src>
import jax
import jax.numpy as jnp
import numpy as np
from jax.experimental import pallas as pl
from jax.experimental.pallas import tpu as pltpu

EPS = 1e-12

# packed accumulator columns in the (C, 8) scratch buffer
S_SHIFT, S_SX, S_SXX, S_GMEAN, S_MRUN, S_SP, S_SPY, S_SPYY = range(8)


def _round_up(v, m):
    return -(-v // m) * m


def _est_vmem_bytes(C, A, tl, cache_len, w_itemsize):
    """Rough per-core VMEM working set (double-buffered blocks + scratch)."""
    e = 2 * C * tl * 4                                    # x tile, double-buffered
    e += 2 * (A * C + A * 2 * C) * w_itemsize             # w1x, w1ms
    e += 2 * C * A * 4                                    # w2 (kept f32)
    e += 2 * (3 * A + C + 2 * C) * 4                      # biases + output block
    e += (_round_up(C, 8) + _round_up(A, 8)) * 128 * 4    # packed acc + ctx scratch
    e += (C + A) * cache_len * 4                          # x / pre-activation caches
    return e


def attentive_statistics_pooling(x_bcl, params, *, time_tile=512,
                                 matmul_dtype=jnp.bfloat16, allow_cache=True):
    """x_bcl: (B, C, L) float32 (native PyTorch layout). Returns (B, 2C, 1)."""
    B, C, L = x_bcl.shape
    A = params["b1"].shape[0]
    x_bcl = x_bcl.astype(jnp.float32)

    witem = jnp.dtype(matmul_dtype).itemsize

    # ---- per-generation VMEM budget (v7x: 64 MiB, v5e/v6e: 128 MiB) ----------
    try:
        vmem_cap = int(pltpu.get_tpu_info().vmem_capacity_bytes)
    except Exception:
        vmem_cap = 64 * 1024 * 1024          # conservative (fits v7x)
    vmem_limit = max(32 * 1024 * 1024,
                     min(vmem_cap - 16 * 1024 * 1024, 100 * 1024 * 1024))
    budget = int(0.80 * vmem_limit)

    # ---- time tiling: multiples of 128, ragged last tile handled in-kernel ---
    if L <= 128:
        tl = L                                # full-dim block is always legal
    else:
        req = max(128, (int(time_tile) // 128) * 128)
        tl = min(req, pl.cdiv(L, 128) * 128)
        while tl > 128 and _est_vmem_bytes(C, A, tl, 0, witem) > budget:
            tl -= 128                         # shrink only if streaming won't fit
    nl = pl.cdiv(L, tl)
    ragged = (nl * tl != L)
    Lpad = nl * tl
    inv_l = float(1.0 / L)

    # single-pass x/h caches only when they fit the budget and there is >1 tile
    use_cache = bool(allow_cache and nl > 1
                     and _est_vmem_bytes(C, A, tl, Lpad, witem) <= budget)

    cdt = jnp.dtype(matmul_dtype)
    w1x = params["w1x"].astype(cdt)               # (A, C)
    w1ms = params["w1ms"].astype(cdt)             # (A, 2C)  == [w1_mean | w1_std]
    w2 = params["w2"].astype(jnp.float32)         # (C, A)  — cheap logit matmul stays f32
    b1 = params["b1"].astype(jnp.float32)         # (A, 1)
    bns = params["bn_scale"].astype(jnp.float32)  # (A, 1)
    bnb = params["bn_shift"].astype(jnp.float32)  # (A, 1)
    b2 = params["b2"].astype(jnp.float32)         # (C, 1)

    def kernel(x_ref, w1x_ref, w1ms_ref, b1_ref, bns_ref, bnb_ref,
               w2_ref, b2_ref, out_ref, acc, ctx, *caches):
        if use_cache:
            xcache, hcache = caches
        ph = pl.program_id(1)
        l = pl.program_id(2)

        def col(k):
            return acc[:, k:k + 1]

        def set_col(k, v):
            acc[:, k:k + 1] = v

        def time_mask():
            t = l * tl + jax.lax.broadcasted_iota(jnp.int32, (1, tl), 1)
            return t < L

        # ---------------- phase 0: stream x from HBM exactly once ------------
        @pl.when((ph == 0) & (l == 0))
        def _():
            set_col(S_SHIFT, x_ref[0, :, 0:1])   # per-channel shift => stable var
            set_col(S_SX, jnp.zeros((C, 1), jnp.float32))
            set_col(S_SXX, jnp.zeros((C, 1), jnp.float32))

        @pl.when(ph == 0)
        def _():
            x = x_ref[0]                                  # (C, tl) f32
            if ragged:
                x = jnp.where(time_mask(), x, 0.0)        # also sanitizes OOB pad
            xs = x - col(S_SHIFT)
            if ragged:
                xs = jnp.where(time_mask(), xs, 0.0)
            set_col(S_SX, col(S_SX) + jnp.sum(xs, axis=-1, keepdims=True))
            set_col(S_SXX, col(S_SXX) + jnp.sum(xs * xs, axis=-1, keepdims=True))
            if use_cache:
                t0 = pl.multiple_of(l * tl, tl)
                xcache[:, pl.ds(t0, tl)] = x
                # Big (A,C)@(C,tl) matmul hoisted under the phase-0 DMA stream.
                hcache[:, pl.ds(t0, tl)] = jnp.dot(
                    w1x_ref[...], x.astype(w1x_ref.dtype),
                    preferred_element_type=jnp.float32)

        # ------ phase 1, first tile: finalize global stats + context conv ----
        @pl.when((ph == 1) & (l == 0))
        def _():
            mu = col(S_SX) * inv_l
            gmean = col(S_SHIFT) + mu
            gvar = jnp.maximum(col(S_SXX) * inv_l - mu * mu, EPS)
            gstd = jnp.sqrt(gvar)
            set_col(S_GMEAN, gmean)
            g = jnp.concatenate([gmean, gstd], axis=0)           # (2C, 1)
            ctx[...] = (jnp.dot(w1ms_ref[...], g.astype(w1ms_ref.dtype),
                                preferred_element_type=jnp.float32)
                        + b1_ref[...])                           # (A, 1)
            set_col(S_MRUN, jnp.full((C, 1), -1e30, jnp.float32))  # finite init
            set_col(S_SP, jnp.zeros((C, 1), jnp.float32))
            set_col(S_SPY, jnp.zeros((C, 1), jnp.float32))
            set_col(S_SPYY, jnp.zeros((C, 1), jnp.float32))

        # -------- phase 1: attention + online-softmax weighted statistics ----
        @pl.when(ph == 1)
        def _():
            if use_cache:
                t0 = pl.multiple_of(l * tl, tl)
                xt = xcache[:, pl.ds(t0, tl)]                    # (C, tl)
                hpre = hcache[:, pl.ds(t0, tl)]                  # (A, tl)
            else:
                xt = x_ref[0]
                if ragged:
                    xt = jnp.where(time_mask(), xt, 0.0)
                hpre = jnp.dot(w1x_ref[...], xt.astype(w1x_ref.dtype),
                               preferred_element_type=jnp.float32)
            h = jnp.maximum(hpre + ctx[...], 0.0)                # conv1 + ReLU
            h = h * bns_ref[...] + bnb_ref[...]                  # folded eval BN
            h = jnp.tanh(h)                                      # f32 (no bf16 EUP on v5e)
            # cheap logit matmul stays f32 for softmax parity with PyTorch
            a = jnp.dot(w2_ref[...], h,
                        preferred_element_type=jnp.float32) + b2_ref[...]   # (C, tl)
            if ragged:
                a = jnp.where(time_mask(), a, -1e30)

            # online softmax over time (lanes), streamed across tiles
            m_run = col(S_MRUN)
            m_new = jnp.maximum(m_run, jnp.max(a, axis=-1, keepdims=True))
            alpha = jnp.exp(m_run - m_new)
            p = jnp.exp(a - m_new)                               # unnormalized weights
            y = xt - col(S_GMEAN)                                # centered -> stable var
            py = p * y
            # NOTE: if a v6e bundle dump shows the XLU saturating on these three
            # lane-sums, offload them to the MXU via a dot with ones((tl, 1)).
            set_col(S_SP, alpha * col(S_SP) + jnp.sum(p, axis=-1, keepdims=True))
            set_col(S_SPY, alpha * col(S_SPY) + jnp.sum(py, axis=-1, keepdims=True))
            set_col(S_SPYY, alpha * col(S_SPYY) + jnp.sum(py * y, axis=-1, keepdims=True))
            set_col(S_MRUN, m_new)

        # -------- phase 1, last tile: finalize attentive mean / std ----------
        @pl.when((ph == 1) & (l == nl - 1))
        def _():
            inv = 1.0 / col(S_SP)            # tiny (C,1) divide, done once
            my = col(S_SPY) * inv
            var = jnp.maximum(col(S_SPYY) * inv - my * my, EPS)
            out_ref[0, :C, :] = col(S_GMEAN) + my                # attentive mean
            out_ref[0, C:, :] = jnp.sqrt(var)                    # attentive std

    const = lambda shape: pl.BlockSpec(shape, lambda b, ph, l: (0,) * len(shape))
    if use_cache:
        # phase 1 maps onto the last phase-0 block => no new DMAs in phase 1
        x_map = lambda b, ph, l: (b, 0, l * (1 - ph) + (nl - 1) * ph)
    else:
        x_map = lambda b, ph, l: (b, 0, l)

    scratch = [pltpu.VMEM((C, 8), jnp.float32),   # packed accumulators
               pltpu.VMEM((A, 1), jnp.float32)]   # ctx (context conv + b1)
    if use_cache:
        scratch += [pltpu.VMEM((C, Lpad), jnp.float32),   # x cache (masked)
                    pltpu.VMEM((A, Lpad), jnp.float32)]   # w1x @ x pre-activation

    out = pl.pallas_call(
        kernel,
        grid=(B, 2, nl),
        in_specs=[
            pl.BlockSpec((1, C, tl), x_map),   # x (native B, C, L)
            const((A, C)),        # w1x
            const((A, 2 * C)),    # w1ms = [w1_mean | w1_std]
            const((A, 1)),        # b1
            const((A, 1)),        # bn scale
            const((A, 1)),        # bn shift
            const((C, A)),        # w2
            const((C, 1)),        # b2
        ],
        out_specs=pl.BlockSpec((1, 2 * C, 1), lambda b, ph, l: (b, 0, 0)),
        out_shape=jax.ShapeDtypeStruct((B, 2 * C, 1), jnp.float32),
        scratch_shapes=scratch,
        compiler_params=pltpu.CompilerParams(
            dimension_semantics=("parallel", "arbitrary", "arbitrary"),
            vmem_limit_bytes=int(vmem_limit),
        ),
    )(x_bcl, w1x, w1ms, b1, bns, bnb, w2, b2)
    return out


def _reference(x_bcl, params):
    """Pure-JAX reference mirroring the PyTorch forward (lengths=None, eval BN)."""
    x = x_bcl.astype(jnp.float32)
    B, C, L = x.shape
    m = jnp.full((B, 1, L), 1.0 / L, jnp.float32)
    mean = jnp.sum(m * x, axis=2)
    std = jnp.sqrt(jnp.maximum(
        jnp.sum(m * (x - mean[:, :, None]) ** 2, axis=2), EPS))
    attn_in = jnp.concatenate(
        [x, jnp.repeat(mean[:, :, None], L, 2), jnp.repeat(std[:, :, None], L, 2)],
        axis=1)
    w1 = jnp.concatenate([params["w1x"], params["w1ms"]], axis=1)   # (A, 3C)
    h = jnp.einsum("ac,bcl->bal", w1, attn_in) + params["b1"][None]
    h = jnp.maximum(h, 0.0)
    h = h * params["bn_scale"][None] + params["bn_shift"][None]
    h = jnp.tanh(h)
    a = jnp.einsum("ca,bal->bcl", params["w2"], h) + params["b2"][None]
    w = jax.nn.softmax(a, axis=2)
    mean2 = jnp.sum(w * x, axis=2)
    std2 = jnp.sqrt(jnp.maximum(
        jnp.sum(w * (x - mean2[:, :, None]) ** 2, axis=2), EPS))
    return jnp.concatenate([mean2, std2], axis=1)[:, :, None]


def _init_params(key, channels, attention_channels):
    C, A = channels, attention_channels
    ks = jax.random.split(key, 8)
    # Conv1d(3C -> A, k=1): weight (A, 3C, 1) -> (A, 3C); split as x | [mean,std]
    w1 = 0.2 * jax.random.normal(ks[0], (A, 3 * C), jnp.float32)
    b1 = 0.1 * jax.random.normal(ks[1], (A, 1), jnp.float32)
    # BatchNorm1d(A), eval mode: fold running stats + affine into scale/shift
    gamma = 1.0 + 0.1 * jax.random.normal(ks[2], (A, 1), jnp.float32)
    beta = 0.1 * jax.random.normal(ks[3], (A, 1), jnp.float32)
    run_mean = 0.1 * jax.random.normal(ks[4], (A, 1), jnp.float32)
    run_var = 1.0 + 0.1 * jax.random.uniform(ks[5], (A, 1), jnp.float32)
    bn_eps = 1e-5
    bn_scale = gamma / jnp.sqrt(run_var + bn_eps)
    bn_shift = beta - run_mean * bn_scale
    # Conv1d(A -> C, k=1): weight (C, A, 1) -> (C, A)
    w2 = 0.2 * jax.random.normal(ks[6], (C, A), jnp.float32)
    b2 = 0.1 * jax.random.normal(ks[7], (C, 1), jnp.float32)
    return {"w1x": w1[:, :C], "w1ms": w1[:, C:], "b1": b1,
            "bn_scale": bn_scale, "bn_shift": bn_shift, "w2": w2, "b2": b2}


if __name__ == "__main__":
    # Small shapes that exercise: multi-tile time pipeline, ragged last tile,
    # single-pass VMEM cache path, and the two-pass streaming fallback.
    B, C, L = 2, 64, 300       # batch, channels, time (300 = 2*128 + 44 -> ragged)
    A = 32                     # attention_channels (original default is 128)

    key = jax.random.PRNGKey(0)
    kx, kp, kx2 = jax.random.split(key, 3)
    x = jax.random.normal(kx, (B, C, L), jnp.float32)    # native PyTorch (B, C, L)
    params = _init_params(kp, C, A)

    ref = jax.block_until_ready(_reference(x, params))

    # f32 MXU path, x/h cached in VMEM (single HBM pass), ragged last tile.
    out = attentive_statistics_pooling(x, params, time_tile=128,
                                       matmul_dtype=jnp.float32)
    out = jax.block_until_ready(out)
    assert out.shape == (B, 2 * C, 1)
    np.testing.assert_allclose(np.asarray(out), np.asarray(ref),
                               rtol=2e-4, atol=2e-4)

    # default bf16 MXU path + forced two-pass streaming fallback (no cache).
    out_bf16 = attentive_statistics_pooling(x, params, time_tile=128,
                                            allow_cache=False)
    out_bf16 = jax.block_until_ready(out_bf16)
    np.testing.assert_allclose(np.asarray(out_bf16), np.asarray(ref),
                               rtol=1e-1, atol=1e-1)

    # non-ragged, single-tile config (tile == full L).
    x2 = jax.random.normal(kx2, (B, C, 256), jnp.float32)
    ref2 = _reference(x2, params)
    out2 = attentive_statistics_pooling(x2, params, time_tile=256,
                                        matmul_dtype=jnp.float32)
    out2 = jax.block_until_ready(out2)
    np.testing.assert_allclose(np.asarray(out2), np.asarray(ref2),
                               rtol=2e-4, atol=2e-4)

    print("KERNEL_OK")
</pallas_src>

<mosaic_0001>
module attributes {stable_mosaic.version = 11 : i64} {
  func.func @kernel(%arg0: i32, %arg1: i32, %arg2: i32, %arg3: memref<1x64x128xf32, #tpu.memory_space<vmem>>, %arg4: memref<32x64xf32, #tpu.memory_space<vmem>>, %arg5: memref<32x128xf32, #tpu.memory_space<vmem>>, %arg6: memref<32x1xf32, #tpu.memory_space<vmem>>, %arg7: memref<32x1xf32, #tpu.memory_space<vmem>>, %arg8: memref<32x1xf32, #tpu.memory_space<vmem>>, %arg9: memref<64x32xf32, #tpu.memory_space<vmem>>, %arg10: memref<64x1xf32, #tpu.memory_space<vmem>>, %arg11: memref<1x128x1xf32, #tpu.memory_space<vmem>>, %arg12: memref<64x8xf32, #tpu.memory_space<vmem>>, %arg13: memref<32x1xf32, #tpu.memory_space<vmem>>, %arg14: memref<64x384xf32, #tpu.memory_space<vmem>>, %arg15: memref<32x384xf32, #tpu.memory_space<vmem>>) attributes {dimension_semantics = [#tpu.dimension_semantics<parallel>, #tpu.dimension_semantics<arbitrary>, #tpu.dimension_semantics<arbitrary>], iteration_bounds = array<i64: 2, 2, 3>, scalar_prefetch = 0 : i64, scratch_operands = 4 : i64, tpu.core_type = #tpu.core_type<tc>, window_params = [{transform_indices = @transform_0, window_bounds = array<i64: 1, 64, 128>}, {pipeline_mode = #tpu.pipeline_mode<synchronous>, transform_indices = @transform_1, window_bounds = array<i64: 32, 64>}, {pipeline_mode = #tpu.pipeline_mode<synchronous>, transform_indices = @transform_2, window_bounds = array<i64: 32, 128>}, {pipeline_mode = #tpu.pipeline_mode<synchronous>, transform_indices = @transform_3, window_bounds = array<i64: 32, 1>}, {pipeline_mode = #tpu.pipeline_mode<synchronous>, transform_indices = @transform_4, window_bounds = array<i64: 32, 1>}, {pipeline_mode = #tpu.pipeline_mode<synchronous>, transform_indices = @transform_5, window_bounds = array<i64: 32, 1>}, {pipeline_mode = #tpu.pipeline_mode<synchronous>, transform_indices = @transform_6, window_bounds = array<i64: 64, 32>}, {pipeline_mode = #tpu.pipeline_mode<synchronous>, transform_indices = @transform_7, window_bounds = array<i64: 64, 1>}, {transform_indices = @transform_8, window_bounds = array<i64: 1, 128, 1>}]} {
    %c0_i32 = arith.constant 0 : i32
    %0 = arith.cmpi eq, %arg1, %c0_i32 : i32
    %c0_i32_0 = arith.constant 0 : i32
    %1 = arith.cmpi eq, %arg2, %c0_i32_0 : i32
    %2 = arith.andi %0, %1 : i1
    %3 = arith.extui %2 : i1 to i32
    %c0_i32_1 = arith.constant 0 : i32
    %4 = arith.cmpi ne, %3, %c0_i32_1 : i32
    scf.if %4 {
      %c0 = arith.constant 0 : index
      %c0_10 = arith.constant 0 : index
      %c0_11 = arith.constant 0 : index
      %21 = vector.load %arg3[%c0, %c0_10, %c0_11] : memref<1x64x128xf32, #tpu.memory_space<vmem>>, vector<1x64x1xf32>
      %22 = vector.shape_cast %21 : vector<1x64x1xf32> to vector<64x1xf32>
      %c0_12 = arith.constant 0 : index
      %c0_13 = arith.constant 0 : index
      %23 = vector.load %arg12[%c0_12, %c0_13] : memref<64x8xf32, #tpu.memory_space<vmem>>, vector<64x1xf32>
      tpu.vector_store %arg12[%c0_12, %c0_13], %22 {strides = array<i32>} : memref<64x8xf32, #tpu.memory_space<vmem>>, vector<64x1xf32>,
      %cst = arith.constant 0.000000e+00 : f32
      %24 = vector.broadcast %cst : f32 to vector<64x1xf32>
      %c0_14 = arith.constant 0 : index
      %c1 = arith.constant 1 : index
      %25 = vector.load %arg12[%c0_14, %c1] : memref<64x8xf32, #tpu.memory_space<vmem>>, vector<64x1xf32>
      tpu.vector_store %arg12[%c0_14, %c1], %24 {strides = array<i32>} : memref<64x8xf32, #tpu.memory_space<vmem>>, vector<64x1xf32>,
      %cst_15 = arith.constant 0.000000e+00 : f32
      %26 = vector.broadcast %cst_15 : f32 to vector<64x1xf32>
      %c0_16 = arith.constant 0 : index
      %c2 = arith.constant 2 : index
      %27 = vector.load %arg12[%c0_16, %c2] : memref<64x8xf32, #tpu.memory_space<vmem>>, vector<64x1xf32>
      tpu.vector_store %arg12[%c0_16, %c2], %26 {strides = array<i32>} : memref<64x8xf32, #tpu.memory_space<vmem>>, vector<64x1xf32>,
    } else {
    }
    %c0_i32_2 = arith.constant 0 : i32
    %5 = arith.cmpi eq, %arg1, %c0_i32_2 : i32
    %6 = arith.extui %5 : i1 to i32
    %c0_i32_3 = arith.constant 0 : i32
    %7 = arith.cmpi ne, %6, %c0_i32_3 : i32
    scf.if %7 {
      %c0 = arith.constant 0 : index
      %c0_10 = arith.constant 0 : index
      %c0_11 = arith.constant 0 : index
      %21 = vector.load %arg3[%c0, %c0_10, %c0_11] : memref<1x64x128xf32, #tpu.memory_space<vmem>>, vector<1x64x128xf32>
      %22 = vector.shape_cast %21 : vector<1x64x128xf32> to vector<64x128xf32>
      %c128_i32 = arith.constant 128 : i32
      %23 = arith.muli %arg2, %c128_i32 : i32
      %24 = tpu.iota {dimensions = array<i32: 1>} : vector<1x128xi32>
      %25 = vector.broadcast %23 : i32 to vector<1x128xi32>
      %26 = arith.addi %25, %24 : vector<1x128xi32>
      %c300_i32 = arith.constant 300 : i32
      %27 = vector.broadcast %c300_i32 : i32 to vector<1x128xi32>
      %28 = arith.cmpi slt, %26, %27 : vector<1x128xi32>
      %cst = arith.constant 0.000000e+00 : f32
      %29 = vector.shape_cast %28 : vector<1x128xi1> to vector<1x128xi1>
      %30 = vector.broadcast %29 : vector<1x128xi1> to vector<64x128xi1>
      %31 = vector.broadcast %cst : f32 to vector<64x128xf32>
      %32 = arith.select %30, %22, %31 : vector<64x128xi1>, vector<64x128xf32>
      %c0_12 = arith.constant 0 : index
      %c0_13 = arith.constant 0 : index
      %33 = vector.load %arg12[%c0_12, %c0_13] : memref<64x8xf32, #tpu.memory_space<vmem>>, vector<64x1xf32>
      %34 = vector.broadcast %33 : vector<64x1xf32> to vector<64x128xf32>
      %35 = arith.subf %32, %34 : vector<64x128xf32>
      %c128_i32_14 = arith.constant 128 : i32
      %36 = arith.muli %arg2, %c128_i32_14 : i32
      %37 = tpu.iota {dimensions = array<i32: 1>} : vector<1x128xi32>
      %38 = vector.broadcast %36 : i32 to vector<1x128xi32>
      %39 = arith.addi %38, %37 : vector<1x128xi32>
      %c300_i32_15 = arith.constant 300 : i32
      %40 = vector.broadcast %c300_i32_15 : i32 to vector<1x128xi32>
      %41 = arith.cmpi slt, %39, %40 : vector<1x128xi32>
      %cst_16 = arith.constant 0.000000e+00 : f32
      %42 = vector.shape_cast %41 : vector<1x128xi1> to vector<1x128xi1>
      %43 = vector.broadcast %42 : vector<1x128xi1> to vector<64x128xi1>
      %44 = vector.broadcast %cst_16 : f32 to vector<64x128xf32>
      %45 = arith.select %43, %35, %44 : vector<64x128xi1>, vector<64x128xf32>
      %c0_17 = arith.constant 0 : index
      %c1 = arith.constant 1 : index
      %46 = vector.load %arg12[%c0_17, %c1] : memref<64x8xf32, #tpu.memory_space<vmem>>, vector<64x1xf32>
      %cst_18 = arith.constant dense<0.000000e+00> : vector<64xf32>
      %47 = vector.multi_reduction <add>, %45, %cst_18 [1] : vector<64x128xf32> to vector<64xf32>
      %48 = vector.shape_cast %47 : vector<64xf32> to vector<64x1xf32>
      %49 = arith.addf %46, %48 : vector<64x1xf32>
      %c0_19 = arith.constant 0 : index
      %c1_20 = arith.constant 1 : index
      %50 = vector.load %arg12[%c0_19, %c1_20] : memref<64x8xf32, #tpu.memory_space<vmem>>, vector<64x1xf32>
      tpu.vector_store %arg12[%c0_19, %c1_20], %49 {strides = array<i32>} : memref<64x8xf32, #tpu.memory_space<vmem>>, vector<64x1xf32>,
      %c0_21 = arith.constant 0 : index
      %c2 = arith.constant 2 : index
      %51 = vector.load %arg12[%c0_21, %c2] : memref<64x8xf32, #tpu.memory_space<vmem>>, vector<64x1xf32>
      %52 = arith.mulf %45, %45 : vector<64x128xf32>
      %cst_22 = arith.constant dense<0.000000e+00> : vector<64xf32>
      %53 = vector.multi_reduction <add>, %52, %cst_22 [1] : vector<64x128xf32> to vector<64xf32>
      %54 = vector.shape_cast %53 : vector<64xf32> to vector<64x1xf32>
      %55 = arith.addf %51, %54 : vector<64x1xf32>
      %c0_23 = arith.constant 0 : index
      %c2_24 = arith.constant 2 : index
      %56 = vector.load %arg12[%c0_23, %c2_24] : memref<64x8xf32, #tpu.memory_space<vmem>>, vector<64x1xf32>
      tpu.vector_store %arg12[%c0_23, %c2_24], %55 {strides = array<i32>} : memref<64x8xf32, #tpu.memory_space<vmem>>, vector<64x1xf32>,
      %c128_i32_25 = arith.constant 128 : i32
      %57 = arith.muli %arg2, %c128_i32_25 : i32
      %58 = tpu.assume_multiple %57, 128 : i32
      %c0_26 = arith.constant 0 : index
      %59 = arith.index_cast %58 : i32 to index
      %60 = vector.load %arg14[%c0_26, %59] : memref<64x384xf32, #tpu.memory_space<vmem>>, vector<64x128xf32>
      tpu.vector_store %arg14[%c0_26, %59], %32 {strides = array<i32>} : memref<64x384xf32, #tpu.memory_space<vmem>>, vector<64x128xf32>,
      %c0_27 = arith.constant 0 : index
      %c0_28 = arith.constant 0 : index
      %61 = vector.load %arg4[%c0_27, %c0_28] : memref<32x64xf32, #tpu.memory_space<vmem>>, vector<32x64xf32>
      %cst_29 = arith.constant dense<0.000000e+00> : vector<32x128xf32>
      %62 = tpu.matmul %61, %32, %cst_29 {dimension_numbers = #tpu.dot_dimension_numbers<[1], [0], [0], [1], [0, 0, 1, 1], [], []>} : vector<32x64xf32>, vector<64x128xf32>, vector<32x128xf32> -> vector<32x128xf32>
      %c0_30 = arith.constant 0 : index
      %63 = arith.index_cast %58 : i32 to index
      %64 = vector.load %arg15[%c0_30, %63] : memref<32x384xf32, #tpu.memory_space<vmem>>, vector<32x128xf32>
      tpu.vector_store %arg15[%c0_30, %63], %62 {strides = array<i32>} : memref<32x384xf32, #tpu.memory_space<vmem>>, vector<32x128xf32>,
    } else {
    }
    %c1_i32 = arith.constant 1 : i32
    %8 = arith.cmpi eq, %arg1, %c1_i32 : i32
    %c0_i32_4 = arith.constant 0 : i32
    %9 = arith.cmpi eq, %arg2, %c0_i32_4 : i32
    %10 = arith.andi %8, %9 : i1
    %11 = arith.extui %10 : i1 to i32
    %c0_i32_5 = arith.constant 0 : i32
    %12 = arith.cmpi ne, %11, %c0_i32_5 : i32
    scf.if %12 {
      %c0 = arith.constant 0 : index
      %c1 = arith.constant 1 : index
      %21 = vector.load %arg12[%c0, %c1] : memref<64x8xf32, #tpu.memory_space<vmem>>, vector<64x1xf32>
      %cst = arith.constant 0.00333333341 : f32
      %22 = vector.broadcast %cst : f32 to vector<64x1xf32>
      %23 = arith.mulf %21, %22 : vector<64x1xf32>
      %c0_10 = arith.constant 0 : index
      %c0_11 = arith.constant 0 : index
      %24 = vector.load %arg12[%c0_10, %c0_11] : memref<64x8xf32, #tpu.memory_space<vmem>>, vector<64x1xf32>
      %25 = arith.addf %24, %23 : vector<64x1xf32>
      %c0_12 = arith.constant 0 : index
      %c2 = arith.constant 2 : index
      %26 = vector.load %arg12[%c0_12, %c2] : memref<64x8xf32, #tpu.memory_space<vmem>>, vector<64x1xf32>
      %cst_13 = arith.constant 0.00333333341 : f32
      %27 = vector.broadcast %cst_13 : f32 to vector<64x1xf32>
      %28 = arith.mulf %26, %27 : vector<64x1xf32>
      %29 = arith.mulf %23, %23 : vector<64x1xf32>
      %30 = arith.subf %28, %29 : vector<64x1xf32>
      %cst_14 = arith.constant 9.99999996E-13 : f32
      %31 = vector.broadcast %cst_14 : f32 to vector<64x1xf32>
      %32 = arith.maximumf %30, %31 : vector<64x1xf32>
      %33 = math.sqrt %32 : vector<64x1xf32>
      %c0_15 = arith.constant 0 : index
      %c3 = arith.constant 3 : index
      %34 = vector.load %arg12[%c0_15, %c3] : memref<64x8xf32, #tpu.memory_space<vmem>>, vector<64x1xf32>
      tpu.vector_store %arg12[%c0_15, %c3], %25 {strides = array<i32>} : memref<64x8xf32, #tpu.memory_space<vmem>>, vector<64x1xf32>,
      %35 = tpu.concatenate %25, %33 in 0 : vector<64x1xf32>, vector<64x1xf32> -> vector<128x1xf32>
      %c0_16 = arith.constant 0 : index
      %c0_17 = arith.constant 0 : index
      %36 = vector.load %arg5[%c0_16, %c0_17] : memref<32x128xf32, #tpu.memory_space<vmem>>, vector<32x128xf32>
      %cst_18 = arith.constant dense<0.000000e+00> : vector<32x1xf32>
      %37 = tpu.matmul %36, %35, %cst_18 {dimension_numbers = #tpu.dot_dimension_numbers<[1], [0], [0], [1], [0, 0, 1, 1], [], []>} : vector<32x128xf32>, vector<128x1xf32>, vector<32x1xf32> -> vector<32x1xf32>
      %c0_19 = arith.constant 0 : index
      %c0_20 = arith.constant 0 : index
      %38 = vector.load %arg6[%c0_19, %c0_20] : memref<32x1xf32, #tpu.memory_space<vmem>>, vector<32x1xf32>
      %39 = arith.addf %37, %38 : vector<32x1xf32>
      %c0_21 = arith.constant 0 : index
      %c0_22 = arith.constant 0 : index
      %40 = vector.load %arg13[%c0_21, %c0_22] : memref<32x1xf32, #tpu.memory_space<vmem>>, vector<32x1xf32>
      tpu.vector_store %arg13[%c0_21, %c0_22], %39 {strides = array<i32>} : memref<32x1xf32, #tpu.memory_space<vmem>>, vector<32x1xf32>,
      %cst_23 = arith.constant -1.000000e+30 : f32
      %41 = vector.broadcast %cst_23 : f32 to vector<64x1xf32>
      %c0_24 = arith.constant 0 : index
      %c4 = arith.constant 4 : index
      %42 = vector.load %arg12[%c0_24, %c4] : memref<64x8xf32, #tpu.memory_space<vmem>>, vector<64x1xf32>
      tpu.vector_store %arg12[%c0_24, %c4], %41 {strides = array<i32>} : memref<64x8xf32, #tpu.memory_space<vmem>>, vector<64x1xf32>,
      %cst_25 = arith.constant 0.000000e+00 : f32
      %43 = vector.broadcast %cst_25 : f32 to vector<64x1xf32>
      %c0_26 = arith.constant 0 : index
      %c5 = arith.constant 5 : index
      %44 = vector.load %arg12[%c0_26, %c5] : memref<64x8xf32, #tpu.memory_space<vmem>>, vector<64x1xf32>
      tpu.vector_store %arg12[%c0_26, %c5], %43 {strides = array<i32>} : memref<64x8xf32, #tpu.memory_space<vmem>>, vector<64x1xf32>,
      %cst_27 = arith.constant 0.000000e+00 : f32
      %45 = vector.broadcast %cst_27 : f32 to vector<64x1xf32>
      %c0_28 = arith.constant 0 : index
      %c6 = arith.constant 6 : index
      %46 = vector.load %arg12[%c0_28, %c6] : memref<64x8xf32, #tpu.memory_space<vmem>>, vector<64x1xf32>
      tpu.vector_store %arg12[%c0_28, %c6], %45 {strides = array<i32>} : memref<64x8xf32, #tpu.memory_space<vmem>>, vector<64x1xf32>,
      %cst_29 = arith.constant 0.000000e+00 : f32
      %47 = vector.broadcast %cst_29 : f32 to vector<64x1xf32>
      %c0_30 = arith.constant 0 : index
      %c7 = arith.constant 7 : index
      %48 = vector.load %arg12[%c0_30, %c7] : memref<64x8xf32, #tpu.memory_space<vmem>>, vector<64x1xf32>
      tpu.vector_store %arg12[%c0_30, %c7], %47 {strides = array<i32>} : memref<64x8xf32, #tpu.memory_space<vmem>>, vector<64x1xf32>,
    } else {
    }
    %c1_i32_6 = arith.constant 1 : i32
    %13 = arith.cmpi eq, %arg1, %c1_i32_6 : i32
    %14 = arith.extui %13 : i1 to i32
    %c0_i32_7 = arith.constant 0 : i32
    %15 = arith.cmpi ne, %14, %c0_i32_7 : i32
    scf.if %15 {
      %c128_i32 = arith.constant 128 : i32
      %21 = arith.muli %arg2, %c128_i32 : i32
      %22 = tpu.assume_multiple %21, 128 : i32
      %c0 = arith.constant 0 : index
      %23 = arith.index_cast %22 : i32 to index
      %24 = vector.load %arg14[%c0, %23] : memref<64x384xf32, #tpu.memory_space<vmem>>, vector<64x128xf32>
      %c0_10 = arith.constant 0 : index
      %25 = arith.index_cast %22 : i32 to index
      %26 = vector.load %arg15[%c0_10, %25] : memref<32x384xf32, #tpu.memory_space<vmem>>, vector<32x128xf32>
      %c0_11 = arith.constant 0 : index
      %c0_12 = arith.constant 0 : index
      %27 = vector.load %arg13[%c0_11, %c0_12] : memref<32x1xf32, #tpu.memory_space<vmem>>, vector<32x1xf32>
      %28 = vector.broadcast %27 : vector<32x1xf32> to vector<32x128xf32>
      %29 = arith.addf %26, %28 : vector<32x128xf32>
      %cst = arith.constant 0.000000e+00 : f32
      %30 = vector.broadcast %cst : f32 to vector<32x128xf32>
      %31 = arith.maximumf %29, %30 : vector<32x128xf32>
      %c0_13 = arith.constant 0 : index
      %c0_14 = arith.constant 0 : index
      %32 = vector.load %arg7[%c0_13, %c0_14] : memref<32x1xf32, #tpu.memory_space<vmem>>, vector<32x1xf32>
      %33 = vector.broadcast %32 : vector<32x1xf32> to vector<32x128xf32>
      %34 = arith.mulf %31, %33 : vector<32x128xf32>
      %c0_15 = arith.constant 0 : index
      %c0_16 = arith.constant 0 : index
      %35 = vector.load %arg8[%c0_15, %c0_16] : memref<32x1xf32, #tpu.memory_space<vmem>>, vector<32x1xf32>
      %36 = vector.broadcast %35 : vector<32x1xf32> to vector<32x128xf32>
      %37 = arith.addf %34, %36 : vector<32x128xf32>
      %38 = math.tanh %37 : vector<32x128xf32>
      %c0_17 = arith.constant 0 : index
      %c0_18 = arith.constant 0 : index
      %39 = vector.load %arg9[%c0_17, %c0_18] : memref<64x32xf32, #tpu.memory_space<vmem>>, vector<64x32xf32>
      %cst_19 = arith.constant dense<0.000000e+00> : vector<64x128xf32>
      %40 = tpu.matmul %39, %38, %cst_19 {dimension_numbers = #tpu.dot_dimension_numbers<[1], [0], [0], [1], [0, 0, 1, 1], [], []>} : vector<64x32xf32>, vector<32x128xf32>, vector<64x128xf32> -> vector<64x128xf32>
      %c0_20 = arith.constant 0 : index
      %c0_21 = arith.constant 0 : index
      %41 = vector.load %arg10[%c0_20, %c0_21] : memref<64x1xf32, #tpu.memory_space<vmem>>, vector<64x1xf32>
      %42 = vector.broadcast %41 : vector<64x1xf32> to vector<64x128xf32>
      %43 = arith.addf %40, %42 : vector<64x128xf32>
      %c128_i32_22 = arith.constant 128 : i32
      %44 = arith.muli %arg2, %c128_i32_22 : i32
      %45 = tpu.iota {dimensions = array<i32: 1>} : vector<1x128xi32>
      %46 = vector.broadcast %44 : i32 to vector<1x128xi32>
      %47 = arith.addi %46, %45 : vector<1x128xi32>
      %c300_i32 = arith.constant 300 : i32
      %48 = vector.broadcast %c300_i32 : i32 to vector<1x128xi32>
      %49 = arith.cmpi slt, %47, %48 : vector<1x128xi32>
      %cst_23 = arith.constant -1.000000e+30 : f32
      %50 = vector.shape_cast %49 : vector<1x128xi1> to vector<1x128xi1>
      %51 = vector.broadcast %50 : vector<1x128xi1> to vector<64x128xi1>
      %52 = vector.broadcast %cst_23 : f32 to vector<64x128xf32>
      %53 = arith.select %51, %43, %52 : vector<64x128xi1>, vector<64x128xf32>
      %c0_24 = arith.constant 0 : index
      %c4 = arith.constant 4 : index
      %54 = vector.load %arg12[%c0_24, %c4] : memref<64x8xf32, #tpu.memory_space<vmem>>, vector<64x1xf32>
      %cst_25 = arith.constant dense<0xFF800000> : vector<64xf32>
      %55 = vector.multi_reduction <maximumf>, %53, %cst_25 [1] : vector<64x128xf32> to vector<64xf32>
      %56 = vector.shape_cast %55 : vector<64xf32> to vector<64x1xf32>
      %57 = arith.maximumf %54, %56 : vector<64x1xf32>
      %58 = arith.subf %54, %57 : vector<64x1xf32>
      %59 = math.exp %58 : vector<64x1xf32>
      %60 = vector.broadcast %57 : vector<64x1xf32> to vector<64x128xf32>
      %61 = arith.subf %53, %60 : vector<64x128xf32>
      %62 = math.exp %61 : vector<64x128xf32>
      %c0_26 = arith.constant 0 : index
      %c3 = arith.constant 3 : index
      %63 = vector.load %arg12[%c0_26, %c3] : memref<64x8xf32, #tpu.memory_space<vmem>>, vector<64x1xf32>
      %64 = vector.broadcast %63 : vector<64x1xf32> to vector<64x128xf32>
      %65 = arith.subf %24, %64 : vector<64x128xf32>
      %66 = arith.mulf %62, %65 : vector<64x128xf32>
      %c0_27 = arith.constant 0 : index
      %c5 = arith.constant 5 : index
      %67 = vector.load %arg12[%c0_27, %c5] : memref<64x8xf32, #tpu.memory_space<vmem>>, vector<64x1xf32>
      %68 = arith.mulf %59, %67 : vector<64x1xf32>
      %cst_28 = arith.constant dense<0.000000e+00> : vector<64xf32>
      %69 = vector.multi_reduction <add>, %62, %cst_28 [1] : vector<64x128xf32> to vector<64xf32>
      %70 = vector.shape_cast %69 : vector<64xf32> to vector<64x1xf32>
      %71 = arith.addf %68, %70 : vector<64x1xf32>
      %c0_29 = arith.constant 0 : index
      %c5_30 = arith.constant 5 : index
      %72 = vector.load %arg12[%c0_29, %c5_30] : memref<64x8xf32, #tpu.memory_space<vmem>>, vector<64x1xf32>
      tpu.vector_store %arg12[%c0_29, %c5_30], %71 {strides = array<i32>} : memref<64x8xf32, #tpu.memory_space<vmem>>, vector<64x1xf32>,
      %c0_31 = arith.constant 0 : index
      %c6 = arith.constant 6 : index
      %73 = vector.load %arg12[%c0_31, %c6] : memref<64x8xf32, #tpu.memory_space<vmem>>, vector<64x1xf32>
      %74 = arith.mulf %59, %73 : vector<64x1xf32>
      %cst_32 = arith.constant dense<0.000000e+00> : vector<64xf32>
      %75 = vector.multi_reduction <add>, %66, %cst_32 [1] : vector<64x128xf32> to vector<64xf32>
      %76 = vector.shape_cast %75 : vector<64xf32> to vector<64x1xf32>
      %77 = arith.addf %74, %76 : vector<64x1xf32>
      %c0_33 = arith.constant 0 : index
      %c6_34 = arith.constant 6 : index
      %78 = vector.load %arg12[%c0_33, %c6_34] : memref<64x8xf32, #tpu.memory_space<vmem>>, vector<64x1xf32>
      tpu.vector_store %arg12[%c0_33, %c6_34], %77 {strides = array<i32>} : memref<64x8xf32, #tpu.memory_space<vmem>>, vector<64x1xf32>,
      %c0_35 = arith.constant 0 : index
      %c7 = arith.constant 7 : index
      %79 = vector.load %arg12[%c0_35, %c7] : memref<64x8xf32, #tpu.memory_space<vmem>>, vector<64x1xf32>
      %80 = arith.mulf %59, %79 : vector<64x1xf32>
      %81 = arith.mulf %66, %65 : vector<64x128xf32>
      %cst_36 = arith.constant dense<0.000000e+00> : vector<64xf32>
      %82 = vector.multi_reduction <add>, %81, %cst_36 [1] : vector<64x128xf32> to vector<64xf32>
      %83 = vector.shape_cast %82 : vector<64xf32> to vector<64x1xf32>
      %84 = arith.addf %80, %83 : vector<64x1xf32>
      %c0_37 = arith.constant 0 : index
      %c7_38 = arith.constant 7 : index
      %85 = vector.load %arg12[%c0_37, %c7_38] : memref<64x8xf32, #tpu.memory_space<vmem>>, vector<64x1xf32>
      tpu.vector_store %arg12[%c0_37, %c7_38], %84 {strides = array<i32>} : memref<64x8xf32, #tpu.memory_space<vmem>>, vector<64x1xf32>,
      %c0_39 = arith.constant 0 : index
      %c4_40 = arith.constant 4 : index
      %86 = vector.load %arg12[%c0_39, %c4_40] : memref<64x8xf32, #tpu.memory_space<vmem>>, vector<64x1xf32>
      tpu.vector_store %arg12[%c0_39, %c4_40], %57 {strides = array<i32>} : memref<64x8xf32, #tpu.memory_space<vmem>>, vector<64x1xf32>,
    } else {
    }
    %c1_i32_8 = arith.constant 1 : i32
    %16 = arith.cmpi eq, %arg1, %c1_i32_8 : i32
    %c2_i32 = arith.constant 2 : i32
    %17 = arith.cmpi eq, %arg2, %c2_i32 : i32
    %18 = arith.andi %16, %17 : i1
    %19 = arith.extui %18 : i1 to i32
    %c0_i32_9 = arith.constant 0 : i32
    %20 = arith.cmpi ne, %19, %c0_i32_9 : i32
    scf.if %20 {
      %c0 = arith.constant 0 : index
      %c5 = arith.constant 5 : index
      %21 = vector.load %arg12[%c0, %c5] : memref<64x8xf32, #tpu.memory_space<vmem>>, vector<64x1xf32>
      %cst = arith.constant 1.000000e+00 : f32
      %22 = vector.broadcast %cst : f32 to vector<64x1xf32>
      %23 = arith.divf %22, %21 : vector<64x1xf32>
      %c0_10 = arith.constant 0 : index
      %c6 = arith.constant 6 : index
      %24 = vector.load %arg12[%c0_10, %c6] : memref<64x8xf32, #tpu.memory_space<vmem>>, vector<64x1xf32>
      %25 = arith.mulf %24, %23 : vector<64x1xf32>
      %c0_11 = arith.constant 0 : index
      %c7 = arith.constant 7 : index
      %26 = vector.load %arg12[%c0_11, %c7] : memref<64x8xf32, #tpu.memory_space<vmem>>, vector<64x1xf32>
      %27 = arith.mulf %26, %23 : vector<64x1xf32>
      %28 = arith.mulf %25, %25 : vector<64x1xf32>
      %29 = arith.subf %27, %28 : vector<64x1xf32>
      %cst_12 = arith.constant 9.99999996E-13 : f32
      %30 = vector.broadcast %cst_12 : f32 to vector<64x1xf32>
      %31 = arith.maximumf %29, %30 : vector<64x1xf32>
      %c0_13 = arith.constant 0 : index
      %c3 = arith.constant 3 : index
      %32 = vector.load %arg12[%c0_13, %c3] : memref<64x8xf32, #tpu.memory_space<vmem>>, vector<64x1xf32>
      %33 = arith.addf %32, %25 : vector<64x1xf32>
      %c0_14 = arith.constant 0 : index
      %c0_15 = arith.constant 0 : index
      %c0_16 = arith.constant 0 : index
      %34 = vector.load %arg11[%c0_14, %c0_15, %c0_16] : memref<1x128x1xf32, #tpu.memory_space<vmem>>, vector<1x64x1xf32>
      %35 = vector.shape_cast %34 : vector<1x64x1xf32> to vector<64x1xf32>
      %36 = vector.shape_cast %33 : vector<64x1xf32> to vector<1x64x1xf32>
      tpu.vector_store %arg11[%c0_14, %c0_15, %c0_16], %36 {strides = array<i32>} : memref<1x128x1xf32, #tpu.memory_space<vmem>>, vector<1x64x1xf32>,
      %37 = math.sqrt %31 : vector<64x1xf32>
      %c0_17 = arith.constant 0 : index
      %c64 = arith.constant 64 : index
      %c0_18 = arith.constant 0 : index
      %38 = vector.load %arg11[%c0_17, %c64, %c0_18] : memref<1x128x1xf32, #tpu.memory_space<vmem>>, vector<1x64x1xf32>
      %39 = vector.shape_cast %38 : vector<1x64x1xf32> to vector<64x1xf32>
      %40 = vector.shape_cast %37 : vector<64x1xf32> to vector<1x64x1xf32>
      tpu.vector_store %arg11[%c0_17, %c64, %c0_18], %40 {strides = array<i32>} : memref<1x128x1xf32, #tpu.memory_space<vmem>>, vector<1x64x1xf32>,
    } else {
    }
    return
  }
  func.func @transform_0(%arg0: i32, %arg1: i32, %arg2: i32) -> (i32, i32, i32) {
    %c1_i32 = arith.constant 1 : i32
    %0 = arith.subi %c1_i32, %arg1 : i32
    %1 = arith.muli %arg2, %0 : i32
    %c2_i32 = arith.constant 2 : i32
    %2 = arith.muli %c2_i32, %arg1 : i32
    %3 = arith.addi %1, %2 : i32
    %c0_i32 = arith.constant 0 : i32
    %c0_i32_0 = arith.constant 0 : i32
    return %arg0, %c0_i32, %3 : i32, i32, i32
  }
  func.func @transform_1(%arg0: i32, %arg1: i32, %arg2: i32) -> (i32, i32) {
    %c0_i32 = arith.constant 0 : i32
    %c0_i32_0 = arith.constant 0 : i32
    %c0_i32_1 = arith.constant 0 : i32
    return %c0_i32, %c0_i32_0 : i32, i32
  }
  func.func @transform_2(%arg0: i32, %arg1: i32, %arg2: i32) -> (i32, i32) {
    %c0_i32 = arith.constant 0 : i32
    %c0_i32_0 = arith.constant 0 : i32
    %c0_i32_1 = arith.constant 0 : i32
    return %c0_i32, %c0_i32_0 : i32, i32
  }
  func.func @transform_3(%arg0: i32, %arg1: i32, %arg2: i32) -> (i32, i32) {
    %c0_i32 = arith.constant 0 : i32
    %c0_i32_0 = arith.constant 0 : i32
    %c0_i32_1 = arith.constant 0 : i32
    return %c0_i32, %c0_i32_0 : i32, i32
  }
  func.func @transform_4(%arg0: i32, %arg1: i32, %arg2: i32) -> (i32, i32) {
    %c0_i32 = arith.constant 0 : i32
    %c0_i32_0 = arith.constant 0 : i32
    %c0_i32_1 = arith.constant 0 : i32
    return %c0_i32, %c0_i32_0 : i32, i32
  }
  func.func @transform_5(%arg0: i32, %arg1: i32, %arg2: i32) -> (i32, i32) {
    %c0_i32 = arith.constant 0 : i32
    %c0_i32_0 = arith.constant 0 : i32
    %c0_i32_1 = arith.constant 0 : i32
    return %c0_i32, %c0_i32_0 : i32, i32
  }
  func.func @transform_6(%arg0: i32, %arg1: i32, %arg2: i32) -> (i32, i32) {
    %c0_i32 = arith.constant 0 : i32
    %c0_i32_0 = arith.constant 0 : i32
    %c0_i32_1 = arith.constant 0 : i32
    return %c0_i32, %c0_i32_0 : i32, i32
  }
  func.func @transform_7(%arg0: i32, %arg1: i32, %arg2: i32) -> (i32, i32) {
    %c0_i32 = arith.constant 0 : i32
    %c0_i32_0 = arith.constant 0 : i32
    %c0_i32_1 = arith.constant 0 : i32
    return %c0_i32, %c0_i32_0 : i32, i32
  }
  func.func @transform_8(%arg0: i32, %arg1: i32, %arg2: i32) -> (i32, i32, i32) {
    %c0_i32 = arith.constant 0 : i32
    %c0_i32_0 = arith.constant 0 : i32
    %c0_i32_1 = arith.constant 0 : i32
    return %arg0, %c0_i32, %c0_i32_0 : i32, i32, i32
  }
}

</mosaic_0001>

<bundles_post_ra>
// kernel: tpu_custom_call.1
= control target key start
LH: loop header
LB: loop body
LE: loop exit
PB: predicated region body
PF: predicated region fallthrough
CT: control target
= control target key end

     0   :  { %s4165_s0 = inlined_call_operand.hbm [shape: f32[2,64,300], index: 0, kind: input, shape index: {}]   ;;  %s4166_s1 = inlined_call_operand.vmem [shape: f32[32,64], index: 1, kind: input, shape index: {}]   ;;  %s4167_s2 = inlined_call_operand.vmem [shape: f32[32,128], index: 2, kind: input, shape index: {}]   ;;  %s4168_s3 = inlined_call_operand.vmem [shape: f32[32,1], index: 3, kind: input, shape index: {}]   ;;  %s4169_s4 = inlined_call_operand.vmem [shape: f32[32,1], index: 4, kind: input, shape index: {}]   ;;  %s4170_s5 = inlined_call_operand.vmem [shape: f32[32,1], index: 5, kind: input, shape index: {}]   ;;  %s4171_s6 = inlined_call_operand.vmem [shape: f32[64,32], index: 6, kind: input, shape index: {}]   ;;  %s4172_s7 = inlined_call_operand.vmem [shape: f32[64,1], index: 7, kind: input, shape index: {}]   ;;  %s4173_s8 = inlined_call_operand.vmem [shape: f32[2,128,1], index: 8, kind: output, shape index: {}]  }
   0x1   :  { %4182 = sst [smem:[#allocation14_spill]] %s4170_s5 }
   0x2   :  { %4183 = sst [smem:[#allocation15_spill]] %s4171_s6 }
   0x3   :  { %4184 = sst [smem:[#allocation16_spill]] %s4172_s7 }
   0x4   :  { %13 = vsyncpa [#allocation7], 0 }
   0x5   :  { %15 = vsyncpa [#allocation7 + $0x1], 0  ;;  %s3013_s27 = smov 0   ;;  %s3015_s28 = smov 0  }
   0x6   :  { %s3017_s29 = smov 0   ;;  %s3019_s30 = smov 0  }
   0x7   :  { %s3021_s9 = smov 0   ;;  %s3023_s10 = smov 0  }
   0x8   :  { %s3025_s11 = smov 0   ;;  %s3027_s12 = smov 0  }
   0x9   :  { %s3029_s13 = smov 0   ;;  %s3031_s14 = smov 0  }
   0xa LB: > { %4185 = sst [smem:[#allocation9_spill]] %s2929_s11  ;;  %s2339_s15 = sadd.s32 4294967295, %s2941_s14   ;;  %s2941_s14 = sphi %s3031_s14, %s21_s14   ;;  %s2937_s13 = sphi %s3029_s13, %s4209_s13   ;;  %s2933_s12 = sphi %s3027_s12, %s4203_s12   ;;  %s2929_s11 = sphi %s3025_s11, %s4202_s11   ;;  %s2925_s10 = sphi %s3023_s10, %s4208_s10   ;;  %s2921_s9 = sphi %s3021_s9, %s4201_s9   ;;  %s2917_s30 = sphi %s3019_s30, %s4200_s30   ;;  %s2913_s29 = sphi %s3017_s29, %s4207_s29   ;;  %s2909_s28 = sphi %s3015_s28, %s4206_s28   ;;  %s2905_s27 = sphi %s3013_s27, %s4205_s27  }
   0xb   : > { %4186 = sst [smem:[#allocation10_spill]] %s2933_s12  ;;  %s33_s16 = sadd.s32 1, %s2929_s11 }
   0xc   : > { %p34_p0 = scmp.ge.s32.totalorder %s33_s16, 3  ;;  %s36_s17 = sadd.s32 1, %s2933_s12 }
   0xd   : > { %s40_s18 = sadd.s32 1, %s2937_s13  ;;  %s44_s19 = ssub.s32 1, %s2933_s12 }
   0xe   : > { %s4211_s16 = smov (%p34_p0, %s33_s16), 0  ;;  %s4213_s17 = smov (!%p34_p0, %s36_s17), %s2933_s12 }
   0xf   : > { %4187 = sst [smem:[#allocation11_spill]] %s4211_s16  ;;  %s45_s20 = smul.u32 %s2929_s11, %s44_s19 }
  0x10   : > { %s2341_s21 = sshll.u32 %s2933_s12, 1  ;;  %p38_p1 = scmp.ge.s32.totalorder %s4213_s17, 2 }
  0x11   : > { %s57_s22 = sadd.s32 1, %s2913_s29  ;;  %s47_s23 = sadd.s32 %s2341_s21, %s45_s20 }
  0x12   : > { %p64_p2 = scmp.ne.s32.totalorder %s2913_s29, %s2909_s28  ;;  %s4215_s17 = smov (%p38_p1, %s4213_s17), 0 }
  0x13   : > { %4188 = sst [smem:[#allocation12_spill]] %s4215_s17  ;;  %s4217_s18 = smov (!%p38_p1, %s40_s18), %s2937_s13 }
  0x14   : > { %s48_s24 = ssub.s32 1, %s4215_s17  ;;  %s2342_s25 = sshll.u32 %s4215_s17, 1 }
  0x15   : > { %p42_p3 = scmp.ge.s32.totalorder %s4217_s18, 2  ;;  %s49_s26 = smul.u32 %s48_s24, %s4211_s16 }
  0x16   : > { %p65_p4 = scmp.eq.s32.totalorder %s2941_s14, 0  ;;  %p70_p5 = scmp.ne.s32.totalorder %s2909_s28, %s2905_s27 }
  0x17   : > { %s4219_s18 = smov (%p42_p3, %s4217_s18), 0  ;;  %s51_s19 = sadd.s32 %s2342_s25, %s49_s26 }
  0x18   : > { %4189 = sst [smem:[#allocation13_spill]] %s4219_s18  ;;  %p3087_p6 = por %p65_p4, %p64_p2 }
  0x19   : > { %s52_s21 = ssub.s32 %s2937_s13, %s4219_s18  ;;  %s53_s12 = ssub.s32 %s47_s23, %s51_s19 }
  0x1a   : > { %s54_s11 = sor.u32 %s53_s12, %s52_s21  ;;  %p71_p7 = scmp.eq.s32.totalorder %s2339_s15, 0 }
  0x1b   : > { %p55_p8 = scmp.eq.s32.totalorder %s54_s11, 0  ;;  %p2606_p10 = scmp.lt.s32.totalorder %s2941_s14, 12 }
  0x1c   : > { %p3093_p9 = por %p71_p7, %p70_p5  ;;  %s288_s24 = sand.u32 1, %s2913_s29  }
  0x1d   : > { %s3099_s27 = scalar_select %p55_p8, %s2913_s29, %s57_s22  }
  0x1e   : > { %s2599_s25 = smul.u32 24, %s2937_s13  ;;  %s2345_s26 = sshll.u32 %s288_s24, 6 }
  0x1f   : > { %s292_s7 = scalar_lea.vmem [#allocation6], %s2345_s26  ;;  %p3112_p11 = pnand %p2606_p10, %p3087_p6 }
  0x20   : > { %s301_s16 = sadd.s32 %s2599_s25, %s47_s23  ;;  %s304_s18 = sshll.u32 %s292_s7, 4  ;;  %s3108_s18 = int_to_ptr.vmem [resolvable:$true] %s304_s18 }
  0x21   : > { %s2347_s6 = sshll.u32 %s301_s16, 7  ;;  %s3117_s7 = scalar_lea.sflag [#allocation7], %s288_s24 }
  0x22   : > { %s3106_s12 = scalar_lea.hbm %s4165_s0, %s2347_s6  ;;  %p2831_p0 = pneg %p3112_p11 }
  0x23   : > { %s2829_s15 = scalar_lea.hbm %s3106_s12, 1024  ;;  %s2834_s16 = scalar_lea.hbm %s4165_s0, 6144 }
  0x24   : > { %p2830_p13 = scmp.ne.s32.totalorder %s3106_s12, %s2829_s15  ;;  %p2835_p3 = scmp.lt.u32.totalorder %s3106_s12, %s4165_s0 }
  0x25   : > { %p2836_p4 = scmp.lt.u32.totalorder %s2834_s16, %s2829_s15  ;;  %p2838_p6 = scmp.lt.u32.totalorder %s2829_s15, %s3106_s12 }
  0x26   : > { %p2832_p1 = pnand %p2831_p0, %p2830_p13 }
  0x27   : > { %p2837_p5 = por %p2836_p4, %p2835_p3 }
  0x28   : > { %p2833_p2 = pneg %p2832_p1 }
  0x29   : > { %p2839_p7 = por %p2838_p6, %p2837_p5 }
  0x2b   : > { %p2840_p8 = pnand %p2839_p7, %p2833_p2 }
  0x2d   : > { %2843 = shalt.err (!%p2840_p8)
}
  0x2e   : > { %s2844_s20 = scalar_lea.vmem %s3108_s18, 1024  ;;  %s2943_s21 = smov [#allocation6]  }
  0x2f   : > { %p2845_p10 = scmp.ne.s32.totalorder %s3108_s18, %s2844_s20  ;;  %s2849_s24 = sshll.u32 %s2943_s21, 4  ;;  %s2850_s24 = int_to_ptr.vmem [resolvable:$false] %s2849_s24 }
  0x30   : > { %s2851_s25 = scalar_lea.vmem %s2850_s24, 2048  ;;  %p2852_p12 = scmp.lt.s32.totalorder %s3108_s18, %s2850_s24 }
  0x31   : > { %p2847_p13 = pnand %p2845_p10, %p2831_p0  ;;  %p2853_p3 = scmp.lt.s32.totalorder %s2851_s25, %s2844_s20 }
  0x33   : > { %p2848_p1 = pneg %p2847_p13  ;;  %p2854_p4 = por %p2853_p3, %p2852_p12 }
  0x35   : > { %p2855_p5 = pnand %p2854_p4, %p2848_p1 }
  0x37   : > { %2858 = shalt.err (!%p2855_p5)
}
  0x38   : > { %s2944_s26 = smov 384   ;;  %s2945_s19 = smov 128  }
  0x39   : > { %s2946_s15 = smov 8   ;;  %p312_p0 = scmp.lt.s32.totalorder %s2941_s14, 13 }
  0x3a   : > { %2605 = dma.hbm_to_vmem [thread:$0]  (!%p3112_p11), %s3106_s12, 1024, %s3108_s18, %s3117_s7, %s2944_s26, %s2945_s19, %s2946_s15  }
  0x3b   : > { %p4193_p2 = scmp.ge.s32.totalorder %s2941_s14, 1 }
  0x3d   : > { %p313_p6 = pnand %p4193_p2, %p312_p0 }
  0x3e   : > { %s318_s5 = sand.u32 (!%p313_p6), 1, %s2909_s28  }
  0x3f   : > { %316 = sbr.rel (%p313_p6) target bundleno = 2822 (0xb06), region = 52  ;;  %s2349_s6 = sshll.u32 (!%p313_p6), %s318_s5, 6 }
  0x40   : > { %s319_s16 = scalar_lea.sflag (!%p313_p6), [#allocation7], %s318_s5  ;;  %s3149_s22 = scalar_lea.vmem (!%p313_p6), [#allocation6], %s2349_s6 }
  0x46   : > { %2900 = dma.done.wait (%p3093_p9), %s319_s16, 1024  }
  0x47   : > { %2902 = vsyncadd (%p3093_p9), %s319_s16, 4294966272  ;;  %p359_p11 = scmp.lt.s32.totalorder %s2925_s10, 1  ;;  %p364_p12 = scmp.eq.s32.totalorder %s2921_s9, 0 }
  0x48   : > { %p365_p7 = scmp.eq.s32.totalorder %s2917_s30, 0 }
  0x49   : > { %s4221_s10 = smov (!%p359_p11, %s2925_s10), 1 }
  0x4a   : > { %p366_p8 = pnand %p365_p7, %p364_p12  ;;  %s2382_s18 = sshll.u32 %s4221_s10, 7 }
  0x4b   : > { %s3164_s7 = scalar_lea.vmem %s4173_s8, %s2382_s18  ;;  %v370_v0 = vld [vmem:[%s3149_s22] sm:$0xff] (!%p366_p8)  ;;  %vm378_vm0 = vcmask (!%p366_p8), 7168   ;;  %v371_v1 = vld [vmem:[%s3149_s22 + $0x8] sm:$0xff] (!%p366_p8)  ;;  %v372_v2 = vld [vmem:[%s3149_s22 + $0x10] sm:$0xff] (!%p366_p8)  ;;  %vm387_vm1 = vcmask (!%p366_p8), 15368   ;;  %vm396_vm2 = vcmask (!%p366_p8), 23568  }
  0x4c   : > { %369 = sbr.rel (%p366_p8) target bundleno = 88 (0x58), region = 60  ;;  %379 = vst.msk [vmem:[#allocation2] sm:$0xff] (!%p366_p8), %vm378_vm0, %v370_v0  ;;  %380 = vst.msk [vmem:[#allocation2 + $0x8] sm:$0xff] (!%p366_p8), %vm378_vm0, %v371_v1  ;;  %v373_v3 = vld [vmem:[%s3149_s22 + $0x18] sm:$0xff] (!%p366_p8)  ;;  %v374_v4 = vld [vmem:[%s3149_s22 + $0x20] sm:$0xff] (!%p366_p8)  ;;  %v2947_v8 = vmov (!%p366_p8), 0.0  }
  0x4d   : > { %381 = vst.msk [vmem:[#allocation2 + $0x10] sm:$0xff] (!%p366_p8), %vm378_vm0, %v372_v2  ;;  %v375_v5 = vld [vmem:[%s3149_s22 + $0x28] sm:$0xff] (!%p366_p8)  ;;  %382 = vst.msk [vmem:[#allocation2 + $0x18] sm:$0xff] (!%p366_p8), %vm378_vm0, %v373_v3  ;;  %v376_v6 = vld [vmem:[%s3149_s22 + $0x30] sm:$0xff] (!%p366_p8) }
  0x4e   : > { %383 = vst.msk [vmem:[#allocation2 + $0x20] sm:$0xff] (!%p366_p8), %vm378_vm0, %v374_v4  ;;  %384 = vst.msk [vmem:[#allocation2 + $0x28] sm:$0xff] (!%p366_p8), %vm378_vm0, %v375_v5  ;;  %v377_v7 = vld [vmem:[%s3149_s22 + $0x38] sm:$0xff] (!%p366_p8) }
  0x4f   : > { %388 = vst.msk [vmem:[#allocation2] sm:$0xff] (!%p366_p8), %vm387_vm1, %v2947_v8  ;;  %389 = vst.msk [vmem:[#allocation2 + $0x8] sm:$0xff] (!%p366_p8), %vm387_vm1, %v2947_v8 }
  0x50   : > { %390 = vst.msk [vmem:[#allocation2 + $0x10] sm:$0xff] (!%p366_p8), %vm387_vm1, %v2947_v8  ;;  %391 = vst.msk [vmem:[#allocation2 + $0x18] sm:$0xff] (!%p366_p8), %vm387_vm1, %v2947_v8 }
  0x51   : > { %385 = vst.msk [vmem:[#allocation2 + $0x30] sm:$0xff] (!%p366_p8), %vm378_vm0, %v376_v6  ;;  %386 = vst.msk [vmem:[#allocation2 + $0x38] sm:$0xff] (!%p366_p8), %vm378_vm0, %v377_v7 }
  0x52   : > { %392 = vst.msk [vmem:[#allocation2 + $0x20] sm:$0xff] (!%p366_p8), %vm387_vm1, %v2947_v8  ;;  %393 = vst.msk [vmem:[#allocation2 + $0x28] sm:$0xff] (!%p366_p8), %vm387_vm1, %v2947_v8 }
  0x53   : > { %397 = vst.msk [vmem:[#allocation2] sm:$0xff] %vm396_vm2, %v2947_v8  ;;  %398 = vst.msk [vmem:[#allocation2 + $0x8] sm:$0xff] %vm396_vm2, %v2947_v8 }
  0x54   : > { %399 = vst.msk [vmem:[#allocation2 + $0x10] sm:$0xff] %vm396_vm2, %v2947_v8  ;;  %400 = vst.msk [vmem:[#allocation2 + $0x18] sm:$0xff] %vm396_vm2, %v2947_v8 }
  0x55   : > { %394 = vst.msk [vmem:[#allocation2 + $0x30] sm:$0xff] %vm387_vm1, %v2947_v8  ;;  %395 = vst.msk [vmem:[#allocation2 + $0x38] sm:$0xff] %vm387_vm1, %v2947_v8 }
  0x56   : > { %401 = vst.msk [vmem:[#allocation2 + $0x20] sm:$0xff] %vm396_vm2, %v2947_v8  ;;  %402 = vst.msk [vmem:[#allocation2 + $0x28] sm:$0xff] %vm396_vm2, %v2947_v8 }
  0x57   : > { %403 = vst.msk [vmem:[#allocation2 + $0x30] sm:$0xff] %vm396_vm2, %v2947_v8  ;;  %404 = vst.msk [vmem:[#allocation2 + $0x38] sm:$0xff] %vm396_vm2, %v2947_v8 }
  0x58 PF: > { %p2352_p9 = scmp.ne.s32.totalorder %s2921_s9, 0 }
  0x59   : > { %s2353_s10 = sshll.u32 (!%p2352_p9), %s2917_s30, 7  ;;  %v417_v11 = vlaneseq (!%p2352_p9)  ;;  %v2948_v12 = vmov (!%p2352_p9), 0   ;;  %v408_v16 = vld [vmem:[%s3149_s22] sm:$0xff] (!%p2352_p9)  ;;  %v409_v18 = vld [vmem:[%s3149_s22 + $0x8] sm:$0xff] (!%p2352_p9)  ;;  %v410_v19 = vld [vmem:[%s3149_s22 + $0x10] sm:$0xff] (!%p2352_p9)  ;;  %vm594_vm3 = vcmask (!%p2352_p9), 523264  }
  0x5a   : > { %407 = sbr.rel (%p2352_p9) target bundleno = 404 (0x194), region = 64  ;;  %2712 = vset.pattern.permute.xlu1 (!%p2352_p9), %v2948_v12  ;;  %2711 = vset.pattern.permute.xlu0 (!%p2352_p9), %v2948_v12  ;;  %v419_v13 = vstv (!%p2352_p9), %s2353_s10  ;;  %s3211_s17 = sshra.s32 (!%p2352_p9), %s2353_s10, 7  ;;  %v411_v20 = vld [vmem:[%s3149_s22 + $0x18] sm:$0xff] (!%p2352_p9)  ;;  %v2507_v22 = vpack.c.bf16 (!%p2352_p9), %v409_v18, %v408_v16  ;;  %v590_v23 = vld [vmem:[%s4166_s1] sm:$0xff] (!%p2352_p9)  ;;  %v592_v24 = vld [vmem:[%s4166_s1 + $0x10] sm:$0xff] (!%p2352_p9)  ;;  %vm520_vm6 = vcmask (!%p2352_p9), 15368  }
  0x5b   : > { %v418_v17 = vand.u32 (!%p2352_p9), 127, %v417_v11  ;;  %s2354_s23 = sshll.u32 (!%p2352_p9), %s3211_s17, 3  ;;  %v2513_v25 = vpack.c.bf16 (!%p2352_p9), %v411_v20, %v410_v19  ;;  %2443 = vmatprep.mubr.msk.f32.mxu0 (!%p2352_p9), %vm594_vm3, %v590_v23  ;;  %2446 = vmatprep.mubr.msk.f32.mxu1 (!%p2352_p9), %vm594_vm3, %v592_v24  ;;  %v412_v33 = vld [vmem:[%s3149_s22 + $0x20] sm:$0xff] (!%p2352_p9)  ;;  %v413_v34 = vld [vmem:[%s3149_s22 + $0x28] sm:$0xff] (!%p2352_p9)  ;;  %v414_v40 = vld [vmem:[%s3149_s22 + $0x30] sm:$0xff] (!%p2352_p9)  ;;  %vm569_vm7 = vcmask (!%p2352_p9), 23568  }
  0x5c   : > { %v3199_v9 = vld [vmem:[#allocation2 + $0x10] sm:$0xff] (!%p2352_p9)  ;;  %v3206_v14 = vld [vmem:[#allocation2 + $0x18] sm:$0xff] (!%p2352_p9)  ;;  %s581_s26 = scalar_lea.vmem (!%p2352_p9), [#allocation4], %s2354_s23  ;;  %v2519_v39 = vpack.c.bf16 (!%p2352_p9), %v413_v34, %v412_v33  ;;  %v591_v45 = vld [vmem:[%s4166_s1 + $0x8] sm:$0xff] (!%p2352_p9)  ;;  %s693_s16 = scalar_lea.vmem (!%p2352_p9), [#allocation5], %s2354_s23 }
  0x5d   : > { %452 = vperm.xlu1 (!%p2352_p9), %2712, %v3199_v9   ;;  %v3217_v21 = vadd.s32 (!%p2352_p9), %v419_v13, %v418_v17  ;;  %v415_v41 = vld [vmem:[%s3149_s22 + $0x38] sm:$0xff] (!%p2352_p9) }
  0x5e   : > { %v3228_v26 = vld [vmem:[#allocation2 + $0x28] sm:$0xff] (!%p2352_p9)  ;;  %v3230_v27 = vld [vmem:[#allocation2 + $0x20] sm:$0xff] (!%p2352_p9)  ;;  %v3270_v37 = vld [vmem:[#allocation2 + $0x38] sm:$0xff] (!%p2352_p9)  ;;  %v2525_v44 = vpack.c.bf16 (!%p2352_p9), %v415_v41, %v414_v40 }
  0x5f   : > { %v3201_v10 = vld [vmem:[#allocation2] sm:$0xff] (!%p2352_p9)  ;;  %v3208_v15 = vld [vmem:[#allocation2 + $0x8] sm:$0xff] (!%p2352_p9)  ;;  %vm421_vm4 = vcmp.lt.s32.totalorder (!%p2352_p9), %v3217_v21, 300  ;;  %v3272_v38 = vld [vmem:[#allocation2 + $0x30] sm:$0xff] (!%p2352_p9) }
  0x60   : > { %442 = vperm.xlu0 (!%p2352_p9), %2711, %v3201_v10   ;;  %vm3235_vm5 = vmpackc.low (!%p2352_p9), %vm421_vm4, %vm421_vm4  ;;  %v426_v29 = vsel (!%p2352_p9), %vm421_vm4, %v410_v19, 0.0  ;;  %v424_v30 = vsel (!%p2352_p9), %vm421_vm4, %v408_v16, 0.0  ;;  %v3247_v31 = vsel (!%p2352_p9), %vm421_vm4, %v411_v20, 0.0  ;;  %v425_v32 = vsel (!%p2352_p9), %vm421_vm4, %v409_v18, 0.0  ;;  %v593_v46 = vld [vmem:[%s4166_s1 + $0x18] sm:$0xff] (!%p2352_p9) }
  0x61   : > { %457 = vperm.xlu1 %2712, %v3206_v14   ;;  %2509 = vmatprep.subr.msk.bf16.mxu0 %vm3235_vm5, %v2507_v22  ;;  %584 = vst [vmem:[%s581_s26 + $0x30] sm:$0xff] %v426_v29  ;;  %582 = vst [vmem:[%s581_s26] sm:$0xff] %v424_v30  ;;  %v429_v35 = vsel %vm421_vm4, %v413_v34, 0.0  ;;  %v428_v36 = vsel %vm421_vm4, %v412_v33, 0.0  ;;  %v431_v42 = vsel %vm421_vm4, %v415_v41, 0.0  ;;  %v430_v43 = vsel %vm421_vm4, %v414_v40, 0.0 }
  0x62   : > { %2571 = vmatprep.subr.msk.bf16.mxu1 %vm3235_vm5, %v2507_v22  ;;  %585 = vst [vmem:[%s581_s26 + $0x48] sm:$0xff] %v3247_v31  ;;  %583 = vst [vmem:[%s581_s26 + $0x18] sm:$0xff] %v425_v32  ;;  %2512 = vmatpush3.bf16.msk.msra.mxu0 %vm3235_vm5, %v2507_v22 }
  0x63   : > { %2575 = vmatpush3.bf16.msk.msra.mxu1 %vm3235_vm5, %v2507_v22  ;;  %587 = vst [vmem:[%s581_s26 + $0x78] sm:$0xff] %v429_v35  ;;  %586 = vst [vmem:[%s581_s26 + $0x60] sm:$0xff] %v428_v36  ;;  %2515 = vmatprep.subr.msk.bf16.mxu0 %vm3235_vm5, %v2513_v25 }
  0x64   : > { %447 = vperm.xlu0 %2711, %v3208_v15   ;;  %2572 = vmatprep.subr.msk.bf16.mxu1 %vm3235_vm5, %v2513_v25  ;;  %589 = vst [vmem:[%s581_s26 + $0xa8] sm:$0xff] %v431_v42  ;;  %588 = vst [vmem:[%s581_s26 + $0x90] sm:$0xff] %v430_v43 }
  0x65   : > { %467 = vperm.xlu1 %2712, %v3228_v26  }
  0x66   : > { %2518 = vmatpush3.bf16.msk.msra.mxu0 %vm3235_vm5, %v2513_v25 }
  0x67   : > { %2576 = vmatpush3.bf16.msk.msra.mxu1 %vm3235_vm5, %v2513_v25  ;;  %2521 = vmatprep.subr.msk.bf16.mxu0 %vm3235_vm5, %v2519_v39 }
  0x68   : > { %462 = vperm.xlu0 %2711, %v3230_v27   ;;  %2573 = vmatprep.subr.msk.bf16.mxu1 %vm3235_vm5, %v2519_v39 }
  0x69   : > { %477 = vperm.xlu1 %2712, %v3270_v37  }
  0x6a   : > { %2524 = vmatpush3.bf16.msk.msra.mxu0 %vm3235_vm5, %v2519_v39 }
  0x6b   : > { %2577 = vmatpush3.bf16.msk.msra.mxu1 %vm3235_vm5, %v2519_v39  ;;  %2527 = vmatprep.subr.msk.bf16.mxu0 %vm3235_vm5, %v2525_v44 }
  0x6c   : > { %472 = vperm.xlu0 %2711, %v3272_v38   ;;  %2574 = vmatprep.subr.msk.bf16.mxu1 %vm3235_vm5, %v2525_v44 }
  0x6e   : > { %2530 = vmatpush3.bf16.msk.msra.mxu0 %vm3235_vm5, %v2525_v44 }
  0x6f   : > { %2578 = vmatpush3.bf16.msk.msra.mxu1 %vm3235_vm5, %v2525_v44 }
  0x71   : > { %2444 = vmatmul.mubr.msk.f32.vlgmr.msra.gmra.mrb[0].mxu0 %vm594_vm3, %v591_v45 }
  0x72   : > { %2447 = vmatmul.mubr.msk.f32.vlgmr.msra.gmra.mrb[0].mxu1 %vm594_vm3, %v593_v46 }
  0xdc   : > { %v453_v47 = vpop.permute.xlu1 %452 }
  0xdd   : > { %v482_v49 = vsub.f32 %v426_v29, %v453_v47 }
  0xdf   : > { %v443_v48 = vpop.permute.xlu0 %442  ;;  %v490_v55 = vsel %vm421_vm4, %v482_v49, 0.0 }
  0xe0   : > { %v480_v50 = vsub.f32 %v424_v30, %v443_v48  ;;  %v458_v52 = vpop.permute.xlu1 %457  ;;  %v539_v11 = vmul.f32 %v490_v55, %v490_v55 }
  0xe1   : > { %v483_v56 = vsub.f32 %v3247_v31, %v458_v52 }
  0xe2   : > { %v488_v51 = vsel %vm421_vm4, %v480_v50, 0.0 }
  0xe3   : > { %v448_v53 = vpop.permute.xlu0 %447  ;;  %496 = vadd.xlane.f32.xlu0 %v488_v51  ;;  %v491_v63 = vsel %vm421_vm4, %v483_v56, 0.0  ;;  %v537_v6 = vmul.f32 %v488_v51, %v488_v51 }
  0xe4   : > { %v481_v54 = vsub.f32 %v425_v32, %v448_v53  ;;  %v468_v58 = vpop.permute.xlu1 %467  ;;  %v540_v12 = vmul.f32 %v491_v63, %v491_v63 }
  0xe5   : > { %v485_v61 = vsub.f32 %v429_v35, %v468_v58 }
  0xe6   : > { %v489_v57 = vsel %vm421_vm4, %v481_v54, 0.0 }
  0xe7   : > { %v463_v59 = vpop.permute.xlu0 %462  ;;  %498 = vadd.xlane.f32.xlu1 %v489_v57  ;;  %500 = vadd.xlane.f32.xlu0 %v490_v55  ;;  %v493_v5 = vsel %vm421_vm4, %v485_v61, 0.0  ;;  %v538_v8 = vmul.f32 %v489_v57, %v489_v57 }
  0xe8   : > { %v484_v60 = vsub.f32 %v428_v36, %v463_v59  ;;  %v478_v0 = vpop.permute.xlu1 %477  ;;  %v542_v16 = vmul.f32 %v493_v5, %v493_v5 }
  0xe9   : > { %v487_v3 = vsub.f32 %v431_v42, %v478_v0 }
  0xea   : > { %v492_v62 = vsel %vm421_vm4, %v484_v60, 0.0 }
  0xeb   : > { %v473_v1 = vpop.permute.xlu0 %472  ;;  %504 = vadd.xlane.f32.xlu1 %v492_v62  ;;  %502 = vadd.xlane.f32.xlu0 %v491_v63  ;;  %v495_v7 = vsel %vm421_vm4, %v487_v3, 0.0  ;;  %v541_v13 = vmul.f32 %v492_v62, %v492_v62 }
  0xec   : > { %v486_v2 = vsub.f32 %v430_v43, %v473_v1  ;;  %v544_v18 = vmul.f32 %v495_v7, %v495_v7 }
  0xee   : > { %v494_v4 = vsel %vm421_vm4, %v486_v2, 0.0 }
  0xef   : > { %508 = vadd.xlane.f32.xlu1 %v494_v4  ;;  %506 = vadd.xlane.f32.xlu0 %v493_v5  ;;  %v543_v17 = vmul.f32 %v494_v4, %v494_v4 }
  0xf3   : > { %510 = vadd.xlane.f32.xlu0 %v495_v7  ;;  %545 = vadd.xlane.f32.xlu1 %v537_v6 }
  0xf7   : > { %547 = vadd.xlane.f32.xlu0 %v538_v8  ;;  %549 = vadd.xlane.f32.xlu1 %v539_v11 }
  0xfb   : > { %551 = vadd.xlane.f32.xlu0 %v540_v12  ;;  %553 = vadd.xlane.f32.xlu1 %v541_v13 }
  0xff   : > { %555 = vadd.xlane.f32.xlu0 %v542_v16  ;;  %557 = vadd.xlane.f32.xlu1 %v543_v17 }
 0x103   : > { %559 = vadd.xlane.f32.xlu0 %v544_v18 }
 0x144   : > { %v2445_v19 = vpop.f32.mrb[0].mxu0 }
 0x145   : > { %v2448_v20 = vpop.f32.mrb[0].mxu1  ;;  %695 = vst [vmem:[%s693_s16 + $0x18] sm:$0xff] %v2445_v19  ;;  %v673_v21 = vpop.f32.mrb[1].mxu0 }
 0x146   : > { %697 = vst [vmem:[%s693_s16 + $0x48] sm:$0xff] %v2448_v20  ;;  %v683_v22 = vpop.f32.mrb[1].mxu1  ;;  %694 = vst [vmem:[%s693_s16] sm:$0xff] %v673_v21 }
 0x147   : > { %696 = vst [vmem:[%s693_s16 + $0x30] sm:$0xff] %v683_v22 }
 0x170   : > { %v497_v23 = vpop.xlane.xlu0 %496 }
 0x171   : > { %v512_v24 = vadd.f32 %v497_v23, %v3201_v10 }
 0x173   : > { %521 = vst.msk [vmem:[#allocation2] sm:$0xff] %vm520_vm6, %v512_v24 }
 0x174   : > { %v499_v25 = vpop.xlane.xlu1 %498  ;;  %v501_v28 = vpop.xlane.xlu0 %500 }
 0x175   : > { %v513_v29 = vadd.f32 %v499_v25, %v3208_v15  ;;  %v514_v30 = vadd.f32 %v501_v28, %v3199_v9 }
 0x177   : > { %522 = vst.msk [vmem:[#allocation2 + $0x8] sm:$0xff] %vm520_vm6, %v513_v29  ;;  %523 = vst.msk [vmem:[#allocation2 + $0x10] sm:$0xff] %vm520_vm6, %v514_v30 }
 0x178   : > { %v505_v31 = vpop.xlane.xlu1 %504  ;;  %v503_v32 = vpop.xlane.xlu0 %502 }
 0x179   : > { %v516_v33 = vadd.f32 %v505_v31, %v3230_v27  ;;  %v515_v34 = vadd.f32 %v503_v32, %v3206_v14 }
 0x17a   : > { %v529_v39 = vld [vmem:[#allocation2] sm:$0xff] }
 0x17b   : > { %525 = vst.msk [vmem:[#allocation2 + $0x20] sm:$0xff] %vm520_vm6, %v516_v33  ;;  %524 = vst.msk [vmem:[#allocation2 + $0x18] sm:$0xff] %vm520_vm6, %v515_v34 }
 0x17c   : > { %v509_v10 = vpop.xlane.xlu1 %508  ;;  %v507_v35 = vpop.xlane.xlu0 %506 }
 0x17d   : > { %v518_v15 = vadd.f32 %v509_v10, %v3272_v38  ;;  %v517_v9 = vadd.f32 %v507_v35, %v3228_v26 }
 0x17e   : > { %v530_v41 = vld [vmem:[#allocation2 + $0x8] sm:$0xff]  ;;  %v531_v38 = vld [vmem:[#allocation2 + $0x10] sm:$0xff] }
 0x17f   : > { %527 = vst.msk [vmem:[#allocation2 + $0x30] sm:$0xff] %vm520_vm6, %v518_v15  ;;  %526 = vst.msk [vmem:[#allocation2 + $0x28] sm:$0xff] %vm520_vm6, %v517_v9 }
 0x180   : > { %v511_v36 = vpop.xlane.xlu0 %510  ;;  %v546_v27 = vpop.xlane.xlu1 %545 }
 0x181   : > { %v519_v14 = vadd.f32 %v511_v36, %v3270_v37  ;;  %v561_v40 = vadd.f32 %v546_v27, %v529_v39 }
 0x182   : > { %v532_v45 = vld [vmem:[#allocation2 + $0x18] sm:$0xff]  ;;  %v533_v47 = vld [vmem:[#allocation2 + $0x20] sm:$0xff] }
 0x183   : > { %528 = vst.msk [vmem:[#allocation2 + $0x38] sm:$0xff] %vm520_vm6, %v519_v14 }
 0x184   : > { %570 = vst.msk [vmem:[#allocation2] sm:$0xff] %vm569_vm7, %v561_v40  ;;  %v548_v42 = vpop.xlane.xlu0 %547  ;;  %v550_v43 = vpop.xlane.xlu1 %549 }
 0x185   : > { %v562_v26 = vadd.f32 %v548_v42, %v530_v41  ;;  %v563_v44 = vadd.f32 %v550_v43, %v531_v38 }
 0x186   : > { %v534_v50 = vld [vmem:[#allocation2 + $0x28] sm:$0xff]  ;;  %v535_v52 = vld [vmem:[#allocation2 + $0x30] sm:$0xff] }
 0x187   : > { %571 = vst.msk [vmem:[#allocation2 + $0x8] sm:$0xff] %vm569_vm7, %v562_v26  ;;  %572 = vst.msk [vmem:[#allocation2 + $0x10] sm:$0xff] %vm569_vm7, %v563_v44 }
 0x188   : > { %v552_v46 = vpop.xlane.xlu0 %551  ;;  %v554_v48 = vpop.xlane.xlu1 %553 }
 0x189   : > { %v564_v37 = vadd.f32 %v552_v46, %v532_v45  ;;  %v565_v49 = vadd.f32 %v554_v48, %v533_v47 }
 0x18a   : > { %v536_v56 = vld [vmem:[#allocation2 + $0x38] sm:$0xff] }
 0x18b   : > { %573 = vst.msk [vmem:[#allocation2 + $0x18] sm:$0xff] %vm569_vm7, %v564_v37  ;;  %574 = vst.msk [vmem:[#allocation2 + $0x20] sm:$0xff] %vm569_vm7, %v565_v49 }
 0x18c   : > { %v556_v51 = vpop.xlane.xlu0 %555  ;;  %v558_v53 = vpop.xlane.xlu1 %557 }
 0x18d   : > { %v566_v54 = vadd.f32 %v556_v51, %v534_v50  ;;  %v567_v55 = vadd.f32 %v558_v53, %v535_v52 }
 0x18f   : > { %575 = vst.msk [vmem:[#allocation2 + $0x28] sm:$0xff] %vm569_vm7, %v566_v54  ;;  %576 = vst.msk [vmem:[#allocation2 + $0x30] sm:$0xff] %vm569_vm7, %v567_v55 }
 0x190   : > { %v560_v57 = vpop.xlane.xlu0 %559 }
 0x191   : > { %v568_v58 = vadd.f32 %v560_v57, %v536_v56 }
 0x193   : > { %577 = vst.msk [vmem:[#allocation2 + $0x38] sm:$0xff] %vm569_vm7, %v568_v58 }
 0x194 PF: > { %p698_p10 = scmp.eq.s32.totalorder %s2921_s9, 1 }
 0x196   : > { %p699_p13 = pnand %p698_p10, %p365_p7 }
 0x197   : > { %v3362_v59 = vld [vmem:[#allocation2 + $0x10] sm:$0xff] (!%p699_p13)  ;;  %v3364_v60 = vld [vmem:[#allocation2] sm:$0xff] (!%p699_p13)  ;;  %v3366_v61 = vld [vmem:[#allocation2 + $0x18] sm:$0xff] (!%p699_p13)  ;;  %s2949_s22 = smov (!%p699_p13), 1   ;;  %s2950_s18 = smov (!%p699_p13), 127  }
 0x198   : > { %702 = sbr.rel (%p699_p13) target bundleno = 904 (0x388), region = 68  ;;  %v713_v62 = vmul.f32 (!%p699_p13), 0.0033333334, %v3362_v59  ;;  %v711_v63 = vmul.f32 (!%p699_p13), 0.0033333334, %v3364_v60  ;;  %v3371_v1 = vld [vmem:[#allocation2 + $0x8] sm:$0xff] (!%p699_p13) }
 0x199   : > { %v714_v0 = vmul.f32 (!%p699_p13), 0.0033333334, %v3366_v61  ;;  %v3373_v2 = vld [vmem:[#allocation2 + $0x28] sm:$0xff] (!%p699_p13)  ;;  %v3375_v3 = vld [vmem:[#allocation2 + $0x20] sm:$0xff] (!%p699_p13)  ;;  %v712_v6 = vmul.f32 (!%p699_p13), 0.0033333334, %v3371_v1 }
 0x19a   : > { %v761_v4 = vmul.f32 (!%p699_p13), %v713_v62, %v713_v62  ;;  %v759_v5 = vmul.f32 (!%p699_p13), %v711_v63, %v711_v63  ;;  %v716_v11 = vmul.f32 (!%p699_p13), 0.0033333334, %v3373_v2  ;;  %v715_v12 = vmul.f32 (!%p699_p13), 0.0033333334, %v3375_v3  ;;  %v3380_v13 = vld [vmem:[#allocation2 + $0x38] sm:$0xff] (!%p699_p13)  ;;  %v3382_v16 = vld [vmem:[#allocation2 + $0x30] sm:$0xff] (!%p699_p13) }
 0x19b   : > { %v762_v7 = vmul.f32 (!%p699_p13), %v714_v0, %v714_v0  ;;  %v760_v8 = vmul.f32 (!%p699_p13), %v712_v6, %v712_v6  ;;  %v718_v19 = vmul.f32 (!%p699_p13), 0.0033333334, %v3380_v13  ;;  %v717_v20 = vmul.f32 (!%p699_p13), 0.0033333334, %v3382_v16  ;;  %s2951_s12 = smov (!%p699_p13), 126   ;;  %s2952_s20 = smov (!%p699_p13), 3  }
 0x19c   : > { %779 = vrot.lane.b32.xlu1 (!%p699_p13), %v761_v4, %s2949_s22  ;;  %775 = vrot.lane.b32.xlu0 (!%p699_p13), %v759_v5, %s2949_s22  ;;  %v764_v17 = vmul.f32 (!%p699_p13), %v716_v11, %v716_v11  ;;  %v763_v18 = vmul.f32 (!%p699_p13), %v715_v12, %v715_v12 }
 0x19d   : > { %v766_v21 = vmul.f32 (!%p699_p13), %v718_v19, %v718_v19  ;;  %v765_v22 = vmul.f32 (!%p699_p13), %v717_v20, %v717_v20 }
 0x1a0   : > { %781 = vrot.lane.b32.xlu1 %v762_v7, %s2949_s22  ;;  %777 = vrot.lane.b32.xlu0 %v760_v8, %s2949_s22 }
 0x1a4   : > { %785 = vrot.lane.b32.xlu1 %v764_v17, %s2949_s22  ;;  %783 = vrot.lane.b32.xlu0 %v763_v18, %s2949_s22 }
 0x1a8   : > { %789 = vrot.lane.b32.xlu1 %v766_v21, %s2949_s22  ;;  %787 = vrot.lane.b32.xlu0 %v765_v22, %s2949_s22 }
 0x1ac   : > { %729 = vrot.lane.b32.xlu1 %v712_v6, %s2950_s18  ;;  %727 = vrot.lane.b32.xlu0 %v711_v63, %s2950_s18 }
 0x1b0   : > { %733 = vrot.lane.b32.xlu1 %v714_v0, %s2950_s18  ;;  %731 = vrot.lane.b32.xlu0 %v713_v62, %s2950_s18 }
 0x1b4   : > { %737 = vrot.lane.b32.xlu1 %v716_v11, %s2950_s18  ;;  %735 = vrot.lane.b32.xlu0 %v715_v12, %s2950_s18 }
 0x1b8   : > { %741 = vrot.lane.b32.xlu1 %v718_v19, %s2950_s18  ;;  %739 = vrot.lane.b32.xlu0 %v717_v20, %s2950_s18 }
 0x20e   : > { %v780_v23 = vpop.permute.xlu1 %779  ;;  %v776_v24 = vpop.permute.xlu0 %775 }
 0x20f   : > { %v801_v25 = vsub.f32 %v713_v62, %v780_v23  ;;  %v799_v28 = vsub.f32 %v711_v63, %v776_v24 }
 0x211   : > { %v809_v29 = vmax.f32 %v801_v25, 1e-12  ;;  %v3386_v30 = vmax.f32 %v799_v28, 1e-12 }
 0x212   : > { %v782_v31 = vpop.permute.xlu1 %781  ;;  %v778_v32 = vpop.permute.xlu0 %777 }
 0x213   : > { %2733 = vrsqrt.f32 %v809_v29  ;;  %v802_v33 = vsub.f32 %v714_v0, %v782_v31  ;;  %v800_v34 = vsub.f32 %v712_v6, %v778_v32  ;;  %vm831_vm8 = vcmp.eq.f32.partialorder %v809_v29, inf }
 0x214   : > { %2735 = vrsqrt.f32 %v3386_v30  ;;  %vm833_vm9 = vcmp.eq.f32.partialorder %v809_v29, 0.0  ;;  %v834_v47 = vand.u32 2147483648, %v809_v29  ;;  %vm817_vm10 = vcmp.eq.f32.partialorder %v3386_v30, inf }
 0x215   : > { %v810_v10 = vmax.f32 %v802_v33, 1e-12  ;;  %v808_v35 = vmax.f32 %v800_v34, 1e-12  ;;  %vm819_vm11 = vcmp.eq.f32.partialorder %v3386_v30, 0.0  ;;  %v820_v50 = vand.u32 2147483648, %v3386_v30 }
 0x216   : > { %v786_v15 = vpop.permute.xlu1 %785  ;;  %v784_v9 = vpop.permute.xlu0 %783 }
 0x217   : > { %2737 = vrsqrt.f32 %v810_v10  ;;  %v804_v36 = vsub.f32 %v716_v11, %v786_v15  ;;  %v803_v39 = vsub.f32 %v715_v12, %v784_v9  ;;  %vm838_vm12 = vcmp.eq.f32.partialorder %v810_v10, inf }
 0x218   : > { %2739 = vrsqrt.f32 %v808_v35  ;;  %vm840_vm13 = vcmp.eq.f32.partialorder %v810_v10, 0.0  ;;  %v841_v53 = vand.u32 2147483648, %v810_v10  ;;  %vm824_vm14 = vcmp.eq.f32.partialorder %v808_v35, inf }
 0x219   : > { %v3389_v27 = vmax.f32 %v804_v36, 1e-12  ;;  %v3391_v14 = vmax.f32 %v803_v39, 1e-12  ;;  %vm826_vm15 = vcmp.eq.f32.partialorder %v808_v35, 0.0  ;;  %v827_v4 = vand.u32 2147483648, %v808_v35 }
 0x21a   : > { %v790_v40 = vpop.permute.xlu1 %789  ;;  %v788_v41 = vpop.permute.xlu0 %787 }
 0x21b   : > { %2741 = vrsqrt.f32 %v3389_v27  ;;  %v806_v42 = vsub.f32 %v718_v19, %v790_v40  ;;  %v805_v38 = vsub.f32 %v717_v20, %v788_v41  ;;  %vm845_vm0 = vcmp.eq.f32.partialorder %v3391_v14, inf }
 0x21c   : > { %2743 = vrsqrt.f32 %v3391_v14  ;;  %vm852_vm1 = vcmp.eq.f32.partialorder %v3389_v27, inf  ;;  %v855_v25 = vand.u32 2147483648, %v3389_v27  ;;  %vm854_vm2 = vcmp.eq.f32.partialorder %v3389_v27, 0.0 }
 0x21d   : > { %v2734_v43 = vpop.eup %2733  ;;  %v3395_v26 = vmax.f32 %v806_v42, 1e-12  ;;  %v3397_v44 = vmax.f32 %v805_v38, 1e-12  ;;  %vm847_vm3 = vcmp.eq.f32.partialorder %v3391_v14, 0.0 }
 0x21e   : > { %v2736_v45 = vpop.eup %2735  ;;  %v830_v46 = vmul.f32 %v2734_v43, %v809_v29  ;;  %v730_v48 = vpop.permute.xlu1 %729 }
 0x21f   : > { %v728_v37 = vpop.permute.xlu0 %727  ;;  %2745 = vrsqrt.f32 %v3395_v26  ;;  %v816_v49 = vmul.f32 %v2736_v45, %v3386_v30  ;;  %v3407_v57 = vadd.f32 %v730_v48, %v3371_v1  ;;  %vm859_vm4 = vcmp.eq.f32.partialorder %v3397_v44, inf }
 0x220   : > { %2747 = vrsqrt.f32 %v3397_v44  ;;  %v832_v52 = vsel %vm831_vm8, %v809_v29, %v830_v46  ;;  %v3410_v58 = vadd.f32 %v728_v37, %v3364_v60  ;;  %v848_v29 = vand.u32 2147483648, %v3391_v14 }
 0x221   : > { %v2738_v51 = vpop.eup %2737  ;;  %v818_v56 = vsel %vm817_vm10, %v3386_v30, %v816_v49  ;;  %v835_v7 = vsel %vm833_vm9, %v834_v47, %v832_v52  ;;  %vm866_vm5 = vcmp.eq.f32.partialorder %v3395_v26, inf  ;;  %v862_v40 = vand.u32 2147483648, %v3397_v44 }
 0x222   : > { %v2740_v54 = vpop.eup %2739  ;;  %v837_v55 = vmul.f32 %v2738_v51, %v810_v10  ;;  %v734_v62 = vpop.permute.xlu1 %733  ;;  %v2531_v60 = vpack.c.bf16 %v3407_v57, %v3410_v58  ;;  %v821_v12 = vsel %vm819_vm11, %v820_v50, %v818_v56  ;;  %vm868_vm6 = vcmp.eq.f32.partialorder %v3395_v26, 0.0 }
 0x223   : > { %v732_v63 = vpop.permute.xlu0 %731  ;;  %v823_v0 = vmul.f32 %v2740_v54, %v808_v35  ;;  %v3413_v5 = vadd.f32 %v734_v62, %v3366_v61  ;;  %vm861_vm7 = vcmp.eq.f32.partialorder %v3397_v44, 0.0  ;;  %vm903_vm8 = vcmask 31768  }
 0x224   : > { %v3416_v6 = vadd.f32 %v732_v63, %v3362_v59  ;;  %v839_v8 = vsel %vm838_vm12, %v810_v10, %v837_v55  ;;  %2532 = vmatprep.subr.bf16.mxu0 %v2531_v60  ;;  %2579 = vmatprep.subr.bf16.mxu1 %v2531_v60  ;;  %vm1042_vm9 = vcmask 39968   ;;  %vm1051_vm10 = vcmask 48168  }
 0x225   : > { %v2742_v1 = vpop.eup %2741  ;;  %v842_v11 = vsel %vm840_vm13, %v841_v53, %v839_v8  ;;  %v825_v61 = vsel %vm824_vm14, %v808_v35, %v823_v0  ;;  %2534 = vmatpush3.bf16.msra.mxu0 %v2531_v60  ;;  %2587 = vmatpush3.bf16.msra.mxu1 %v2531_v60  ;;  %vm1060_vm11 = vcmask 56368   ;;  %vm1069_vm12 = vcmask 64568  }
 0x226   : > { %v2535_v59 = vpack.c.bf16 %v3413_v5, %v3416_v6  ;;  %v2744_v17 = vpop.eup %2743  ;;  %v2718_v18 = vpack.i.bf16 %v842_v11, %v835_v7  ;;  %v828_v19 = vsel %vm826_vm15, %v827_v4, %v825_v61  ;;  %v851_v20 = vmul.f32 %v2742_v1, %v3389_v27  ;;  %v738_v21 = vpop.permute.xlu1 %737  ;;  %v945_v1 = vld [vmem:[%s4167_s2 + $0x8] sm:$0xff]  ;;  %v947_v11 = vld [vmem:[%s4167_s2 + $0x18] sm:$0xff] }
 0x227   : > { %v736_v22 = vpop.permute.xlu0 %735  ;;  %v2713_v23 = vpack.i.bf16 %v828_v19, %v821_v12  ;;  %v844_v24 = vmul.f32 %v2744_v17, %v3391_v14  ;;  %v756_v28 = vadd.f32 %v738_v21, %v3373_v2  ;;  %v2953_v0 = vmov -1e+30   ;;  %v949_v17 = vld [vmem:[%s4168_s3 + $0x8] sm:$0xff]  ;;  %v948_v19 = vld [vmem:[%s4168_s3] sm:$0xff] }
 0x228   : > { %2719 = vrot.lane.b32.xlu1 %v2718_v18, %s2951_s12  ;;  %v853_v30 = vsel %vm852_vm1, %v3389_v27, %v851_v20  ;;  %v755_v31 = vadd.f32 %v736_v22, %v3375_v3  ;;  %2536 = vmatprep.subr.bf16.mxu0 %v2535_v59  ;;  %v869_v27 = vand.u32 2147483648, %v3395_v26  ;;  %v2954_v4 = vmov 0.0   ;;  %v951_v18 = vld [vmem:[%s4168_s3 + $0x18] sm:$0xff]  ;;  %v950_v20 = vld [vmem:[%s4168_s3 + $0x10] sm:$0xff] }
 0x229   : > { %v2746_v32 = vpop.eup %2745  ;;  %2714 = vrot.lane.b32.xlu0 %v2713_v23, %s2951_s12  ;;  %v846_v33 = vsel %vm845_vm0, %v3391_v14, %v844_v24  ;;  %v856_v2 = vsel %vm854_vm2, %v855_v25, %v853_v30  ;;  %2580 = vmatprep.subr.bf16.mxu1 %v2535_v59  ;;  %vm1037_vm13 = vcmask 7168  }
 0x22a   : > { %v2748_v34 = vpop.eup %2747  ;;  %v849_v10 = vsel %vm847_vm3, %v848_v29, %v846_v33  ;;  %v865_v35 = vmul.f32 %v2746_v32, %v3395_v26  ;;  %v2539_v3 = vpack.c.bf16 %v756_v28, %v755_v31  ;;  %v742_v15 = vpop.permute.xlu1 %741  ;;  %2538 = vmatpush3.bf16.msra.mxu0 %v2535_v59  ;;  %2588 = vmatpush3.bf16.msra.mxu1 %v2535_v59 }
 0x22b   : > { %v740_v9 = vpop.permute.xlu0 %739  ;;  %v2723_v36 = vpack.i.bf16 %v856_v2, %v849_v10  ;;  %v858_v39 = vmul.f32 %v2748_v34, %v3397_v44  ;;  %v758_v14 = vadd.f32 %v742_v15, %v3380_v13  ;;  %v944_v13 = vld [vmem:[%s4167_s2] sm:$0xff] }
 0x22c   : > { %v867_v41 = vsel %vm866_vm5, %v3395_v26, %v865_v35  ;;  %v757_v42 = vadd.f32 %v740_v9, %v3382_v16  ;;  %2540 = vmatprep.subr.bf16.mxu0 %v2539_v3  ;;  %2581 = vmatprep.subr.bf16.mxu1 %v2539_v3  ;;  %v946_v26 = vld [vmem:[%s4167_s2 + $0x10] sm:$0xff] }
 0x22d   : > { %2724 = vrot.lane.b32.xlu0 %v2723_v36, %s2951_s12  ;;  %v860_v38 = vsel %vm859_vm4, %v3397_v44, %v858_v39  ;;  %v870_v43 = vsel %vm868_vm6, %v869_v27, %v867_v41  ;;  %2481 = vmatprep.mubr.f32.mxu0 %v944_v13 }
 0x22e   : > { %v863_v16 = vsel %vm861_vm7, %v862_v40, %v860_v38  ;;  %v2543_v45 = vpack.c.bf16 %v758_v14, %v757_v42  ;;  %2484 = vmatprep.mubr.f32.mxu1 %v946_v26  ;;  %2542 = vmatpush3.bf16.msra.mxu0 %v2539_v3 }
 0x22f   : > { %v2728_v46 = vpack.i.bf16 %v870_v43, %v863_v16  ;;  %2589 = vmatpush3.bf16.msra.mxu1 %v2539_v3 }
 0x230   : > { %2544 = vmatprep.subr.bf16.mxu0 %v2543_v45  ;;  %2582 = vmatprep.subr.bf16.mxu1 %v2543_v45 }
 0x231   : > { %2729 = vrot.lane.b32.xlu1 %v2728_v46, %s2951_s12  ;;  %879 = vrot.lane.b32.xlu0 %v3410_v58, %s2952_s20 }
 0x232   : > { %2546 = vmatpush3.bf16.msra.mxu0 %v2543_v45 }
 0x233   : > { %2590 = vmatpush3.bf16.msra.mxu1 %v2543_v45 }
 0x235   : > { %881 = vrot.lane.b32.xlu1 %v3407_v57, %s2952_s20  ;;  %883 = vrot.lane.b32.xlu0 %v3416_v6, %s2952_s20 }
 0x239   : > { %885 = vrot.lane.b32.xlu1 %v3413_v5, %s2952_s20  ;;  %887 = vrot.lane.b32.xlu0 %v755_v31, %s2952_s20 }
 0x23d   : > { %889 = vrot.lane.b32.xlu1 %v756_v28, %s2952_s20  ;;  %891 = vrot.lane.b32.xlu0 %v757_v42, %s2952_s20 }
 0x241   : > { %893 = vrot.lane.b32.xlu1 %v758_v14, %s2952_s20 }
 0x29a   : > { %v2720_v44 = vpop.permute.xlu1 %2719 }
 0x29b   : > { %v2715_v47 = vpop.permute.xlu0 %2714  ;;  %v2722_v48 = vunpack.i.h.bf16 %v2720_v44  ;;  %v2721_v37 = vunpack.i.l.bf16 %v2720_v44 }
 0x29c   : > { %v2717_v49 = vunpack.i.h.bf16 %v2715_v47  ;;  %v2716_v50 = vunpack.i.l.bf16 %v2715_v47 }
 0x29d   : > { %v2551_v53 = vpack.c.bf16 %v2722_v48, %v2721_v37 }
 0x29e   : > { %v2547_v51 = vpack.c.bf16 %v2717_v49, %v2716_v50 }
 0x29f   : > { %v2725_v52 = vpop.permute.xlu0 %2724 }
 0x2a0   : > { %v2727_v54 = vunpack.i.h.bf16 %v2725_v52  ;;  %v2726_v55 = vunpack.i.l.bf16 %v2725_v52  ;;  %2548 = vmatprep.subr.bf16.mxu0 %v2547_v51  ;;  %2583 = vmatprep.subr.bf16.mxu1 %v2547_v51 }
 0x2a1   : > { %2550 = vmatpush3.bf16.msra.mxu0 %v2547_v51  ;;  %2591 = vmatpush3.bf16.msra.mxu1 %v2547_v51 }
 0x2a2   : > { %2552 = vmatprep.subr.bf16.mxu0 %v2551_v53  ;;  %2584 = vmatprep.subr.bf16.mxu1 %v2551_v53  ;;  %v2555_v58 = vpack.c.bf16 %v2727_v54, %v2726_v55 }
 0x2a3   : > { %v2730_v56 = vpop.permute.xlu1 %2729  ;;  %v880_v57 = vpop.permute.xlu0 %879 }
 0x2a4   : > { %v2732_v62 = vunpack.i.h.bf16 %v2730_v56  ;;  %v2731_v63 = vunpack.i.l.bf16 %v2730_v56  ;;  %904 = vst.msk [vmem:[#allocation2] sm:$0xff] %vm903_vm8, %v880_v57 }
 0x2a5   : > { %2554 = vmatpush3.bf16.msra.mxu0 %v2551_v53  ;;  %2592 = vmatpush3.bf16.msra.mxu1 %v2551_v53  ;;  %1043 = vst.msk [vmem:[#allocation2] sm:$0xff] %vm1042_vm9, %v2953_v0 }
 0x2a6   : > { %2556 = vmatprep.subr.bf16.mxu0 %v2555_v58  ;;  %2585 = vmatprep.subr.bf16.mxu1 %v2555_v58  ;;  %1052 = vst.msk [vmem:[#allocation2] sm:$0xff] %vm1051_vm10, %v2954_v4  ;;  %v2559_v7 = vpack.c.bf16 %v2732_v62, %v2731_v63 }
 0x2a7   : > { %v882_v5 = vpop.permute.xlu1 %881  ;;  %1061 = vst.msk [vmem:[#allocation2] sm:$0xff] %vm1060_vm11, %v2954_v4  ;;  %v884_v6 = vpop.permute.xlu0 %883 }
 0x2a8   : > { %905 = vst.msk [vmem:[#allocation2 + $0x8] sm:$0xff] %vm903_vm8, %v882_v5  ;;  %906 = vst.msk [vmem:[#allocation2 + $0x10] sm:$0xff] %vm903_vm8, %v884_v6 }
 0x2a9   : > { %1070 = vst.msk [vmem:[#allocation2] sm:$0xff] %vm1069_vm12, %v2954_v4  ;;  %2558 = vmatpush3.bf16.msra.mxu0 %v2555_v58  ;;  %2593 = vmatpush3.bf16.msra.mxu1 %v2555_v58 }
 0x2aa   : > { %1044 = vst.msk [vmem:[#allocation2 + $0x8] sm:$0xff] %vm1042_vm9, %v2953_v0  ;;  %1045 = vst.msk [vmem:[#allocation2 + $0x10] sm:$0xff] %vm1042_vm9, %v2953_v0  ;;  %2560 = vmatprep.subr.bf16.mxu0 %v2559_v7  ;;  %2586 = vmatprep.subr.bf16.mxu1 %v2559_v7 }
 0x2ab   : > { %1053 = vst.msk [vmem:[#allocation2 + $0x8] sm:$0xff] %vm1051_vm10, %v2954_v4  ;;  %1054 = vst.msk [vmem:[#allocation2 + $0x10] sm:$0xff] %vm1051_vm10, %v2954_v4  ;;  %v886_v8 = vpop.permute.xlu1 %885  ;;  %v888_v60 = vpop.permute.xlu0 %887 }
 0x2ac   : > { %1062 = vst.msk [vmem:[#allocation2 + $0x8] sm:$0xff] %vm1060_vm11, %v2954_v4  ;;  %1063 = vst.msk [vmem:[#allocation2 + $0x10] sm:$0xff] %vm1060_vm11, %v2954_v4 }
 0x2ad   : > { %1071 = vst.msk [vmem:[#allocation2 + $0x8] sm:$0xff] %vm1069_vm12, %v2954_v4  ;;  %1072 = vst.msk [vmem:[#allocation2 + $0x10] sm:$0xff] %vm1069_vm12, %v2954_v4  ;;  %2562 = vmatpush3.bf16.msra.mxu0 %v2559_v7  ;;  %2594 = vmatpush3.bf16.msra.mxu1 %v2559_v7 }
 0x2ae   : > { %907 = vst.msk [vmem:[#allocation2 + $0x18] sm:$0xff] %vm903_vm8, %v886_v8  ;;  %908 = vst.msk [vmem:[#allocation2 + $0x20] sm:$0xff] %vm903_vm8, %v888_v60 }
 0x2af   : > { %1046 = vst.msk [vmem:[#allocation2 + $0x18] sm:$0xff] %vm1042_vm9, %v2953_v0  ;;  %1047 = vst.msk [vmem:[#allocation2 + $0x20] sm:$0xff] %vm1042_vm9, %v2953_v0  ;;  %v890_v12 = vpop.permute.xlu1 %889  ;;  %v892_v61 = vpop.permute.xlu0 %891 }
 0x2b0   : > { %1055 = vst.msk [vmem:[#allocation2 + $0x18] sm:$0xff] %vm1051_vm10, %v2954_v4  ;;  %1056 = vst.msk [vmem:[#allocation2 + $0x20] sm:$0xff] %vm1051_vm10, %v2954_v4  ;;  %2482 = vmatmul.mubr.f32.vlgmr.msra.gmra.mrb[0].mxu0 %v945_v1  ;;  %2485 = vmatmul.mubr.f32.vlgmr.msra.gmra.mrb[0].mxu1 %v947_v11 }
 0x2b1   : > { %1064 = vst.msk [vmem:[#allocation2 + $0x18] sm:$0xff] %vm1060_vm11, %v2954_v4  ;;  %1065 = vst.msk [vmem:[#allocation2 + $0x20] sm:$0xff] %vm1060_vm11, %v2954_v4 }
 0x2b2   : > { %1073 = vst.msk [vmem:[#allocation2 + $0x18] sm:$0xff] %vm1069_vm12, %v2954_v4  ;;  %1074 = vst.msk [vmem:[#allocation2 + $0x20] sm:$0xff] %vm1069_vm12, %v2954_v4 }
 0x2b3   : > { %909 = vst.msk [vmem:[#allocation2 + $0x28] sm:$0xff] %vm903_vm8, %v890_v12  ;;  %910 = vst.msk [vmem:[#allocation2 + $0x30] sm:$0xff] %vm903_vm8, %v892_v61  ;;  %v894_v59 = vpop.permute.xlu1 %893 }
 0x2b4   : > { %1048 = vst.msk [vmem:[#allocation2 + $0x28] sm:$0xff] %vm1042_vm9, %v2953_v0  ;;  %1049 = vst.msk [vmem:[#allocation2 + $0x30] sm:$0xff] %vm1042_vm9, %v2953_v0 }
 0x2b5   : > { %1057 = vst.msk [vmem:[#allocation2 + $0x28] sm:$0xff] %vm1051_vm10, %v2954_v4  ;;  %1058 = vst.msk [vmem:[#allocation2 + $0x30] sm:$0xff] %vm1051_vm10, %v2954_v4 }
 0x2b6   : > { %1066 = vst.msk [vmem:[#allocation2 + $0x28] sm:$0xff] %vm1060_vm11, %v2954_v4  ;;  %1067 = vst.msk [vmem:[#allocation2 + $0x30] sm:$0xff] %vm1060_vm11, %v2954_v4 }
 0x2b7   : > { %1075 = vst.msk [vmem:[#allocation2 + $0x28] sm:$0xff] %vm1069_vm12, %v2954_v4  ;;  %1076 = vst.msk [vmem:[#allocation2 + $0x30] sm:$0xff] %vm1069_vm12, %v2954_v4 }
 0x2b8   : > { %911 = vst.msk [vmem:[#allocation2 + $0x38] sm:$0xff] %vm903_vm8, %v894_v59 }
 0x2b9   : > { %1050 = vst.msk [vmem:[#allocation2 + $0x38] sm:$0xff] %vm1042_vm9, %v2953_v0 }
 0x2ba   : > { %1059 = vst.msk [vmem:[#allocation2 + $0x38] sm:$0xff] %vm1051_vm10, %v2954_v4 }
 0x2bb   : > { %1068 = vst.msk [vmem:[#allocation2 + $0x38] sm:$0xff] %vm1060_vm11, %v2954_v4 }
 0x2bc   : > { %1077 = vst.msk [vmem:[#allocation2 + $0x38] sm:$0xff] %vm1069_vm12, %v2954_v4 }
 0x383   : > { %v2483_v21 = vpop.f32.mrb[0].mxu0  ;;  %v2486_v22 = vpop.f32.mrb[0].mxu1 }
 0x384   : > { %v1024_v23 = vadd.f32 %v2483_v21, %v949_v17  ;;  %v1034_v24 = vadd.f32 %v2486_v22, %v951_v18  ;;  %v1018_v25 = vpop.f32.mrb[1].mxu0  ;;  %v1028_v28 = vpop.f32.mrb[1].mxu1 }
 0x385   : > { %v1019_v29 = vadd.f32 %v1018_v25, %v948_v19  ;;  %v1029_v30 = vadd.f32 %v1028_v28, %v950_v20 }
 0x386   : > { %1039 = vst.msk [vmem:[#allocation3 + $0x8] sm:$0xff] %vm1037_vm13, %v1024_v23  ;;  %1041 = vst.msk [vmem:[#allocation3 + $0x18] sm:$0xff] %vm1037_vm13, %v1034_v24 }
 0x387   : > { %1038 = vst.msk [vmem:[#allocation3] sm:$0xff] %vm1037_vm13, %v1019_v29  ;;  %1040 = vst.msk [vmem:[#allocation3 + $0x10] sm:$0xff] %vm1037_vm13, %v1029_v30 }
 0x388 PF: > { %p2368_p1 = scmp.ne.s32.totalorder %s2921_s9, 1 }
 0x389   : > { %v2955_v33 = vmov (!%p2368_p1), 0   ;;  %v1133_v10 = vld [vmem:[%s4169_s4 + $0x8] sm:$0xff] (!%p2368_p1)  ;;  %v1132_v35 = vld [vmem:[%s4169_s4] sm:$0xff] (!%p2368_p1)  ;;  %s4196_s24 = sld [smem:[#allocation14_spill]] (!%p2368_p1)  ;;  %v1135_v9 = vld [vmem:[%s4169_s4 + $0x18] sm:$0xff] (!%p2368_p1)  ;;  %s4197_s17 = sld [smem:[#allocation16_spill]] (!%p2368_p1) }
 0x38a   : > { %1080 = sbr.rel (%p2368_p1) target bundleno = 2407 (0x967), region = 72  ;;  %2750 = vset.pattern.permute.xlu1 (!%p2368_p1), %v2955_v33  ;;  %2749 = vset.pattern.permute.xlu0 (!%p2368_p1), %v2955_v33  ;;  %v1134_v36 = vld [vmem:[%s4169_s4 + $0x10] sm:$0xff] (!%p2368_p1)  ;;  %s4198_s20 = sld [smem:[#allocation15_spill]] (!%p2368_p1)  ;;  %vm1248_vm14 = vcmask (!%p2368_p1), 261120   ;;  %v3586_v46 = vld [vmem:[#allocation2] sm:$0xff] (!%p2368_p1)  ;;  %v3588_v44 = vld [vmem:[#allocation2 + $0x8] sm:$0xff] (!%p2368_p1) }
 0x38b   : > { %s2956_s26 = smov (!%p2368_p1), 127   ;;  %v3594_v47 = vld [vmem:[#allocation2 + $0x10] sm:$0xff] (!%p2368_p1)  ;;  %s2369_s19 = sshll.u32 (!%p2368_p1), %s2917_s30, 7  ;;  %vm1657_vm0 = vcmask (!%p2368_p1), 48168   ;;  %vm1770_vm1 = vcmask (!%p2368_p1), 56368   ;;  %vm1891_vm2 = vcmask (!%p2368_p1), 64568  }
 0x38c   : > { %s3601_s15 = sshra.s32 (!%p2368_p1), %s2369_s19, 7  ;;  %s2962_s18 = smov (!%p2368_p1), 125   ;;  %vm1900_vm3 = vcmask (!%p2368_p1), 39968  }
 0x38d   : > { %v1103_v2 = vld [vmem:[#allocation3 + $0x18] sm:$0xff] (!%p2368_p1)  ;;  %v1101_v34 = vld [vmem:[#allocation3 + $0x8] sm:$0xff] (!%p2368_p1)  ;;  %s2370_s5 = sshll.u32 (!%p2368_p1), %s3601_s15, 3  ;;  %s2960_s15 = smov (!%p2368_p1), 126  }
 0x38e   : > { %v1102_v31 = vld [vmem:[#allocation3 + $0x10] sm:$0xff] (!%p2368_p1)  ;;  %v1100_v32 = vld [vmem:[#allocation3] sm:$0xff] (!%p2368_p1)  ;;  %s1095_s6 = scalar_lea.vmem (!%p2368_p1), [#allocation5], %s2370_s5  ;;  %s2963_s12 = smov (!%p2368_p1), 3  }
 0x38f   : > { %1116 = vperm.xlu1 (!%p2368_p1), %2750, %v1102_v31   ;;  %1106 = vperm.xlu0 (!%p2368_p1), %2749, %v1100_v32   ;;  %v1161_v3 = vld [vmem:[%s4196_s24 + $0x8] sm:$0xff] (!%p2368_p1)  ;;  %v1160_v15 = vld [vmem:[%s4196_s24] sm:$0xff] (!%p2368_p1)  ;;  %v1163_v39 = vld [vmem:[%s4196_s24 + $0x18] sm:$0xff] (!%p2368_p1) }
 0x390   : > { %v1162_v27 = vld [vmem:[%s4196_s24 + $0x10] sm:$0xff] (!%p2368_p1)  ;;  %v1201_v14 = vld [vmem:[%s4197_s17 + $0x8] sm:$0xff] (!%p2368_p1)  ;;  %v1200_v40 = vld [vmem:[%s4197_s17] sm:$0xff] (!%p2368_p1) }
 0x391   : > { %v1203_v41 = vld [vmem:[%s4197_s17 + $0x18] sm:$0xff]  ;;  %v1202_v42 = vld [vmem:[%s4197_s17 + $0x10] sm:$0xff]  ;;  %v1205_v38 = vld [vmem:[%s4197_s17 + $0x28] sm:$0xff] }
 0x392   : > { %v1204_v43 = vld [vmem:[%s4197_s17 + $0x20] sm:$0xff]  ;;  %v1207_v13 = vld [vmem:[%s4197_s17 + $0x38] sm:$0xff]  ;;  %v1206_v26 = vld [vmem:[%s4197_s17 + $0x30] sm:$0xff] }
 0x393   : > { %1121 = vperm.xlu1 %2750, %v1103_v2   ;;  %1111 = vperm.xlu0 %2749, %v1101_v34   ;;  %v1192_v16 = vld [vmem:[%s4198_s20] sm:$0xff]  ;;  %v1097_v50 = vld [vmem:[%s1095_s6 + $0x18] sm:$0xff]  ;;  %v1098_v62 = vld [vmem:[%s1095_s6 + $0x30] sm:$0xff] }
 0x394   : > { %v1196_v45 = vld [vmem:[%s4198_s20 + $0x20] sm:$0xff]  ;;  %2495 = vmatprep.mubr.msk.f32.mxu0 %vm1248_vm14, %v1192_v16  ;;  %v1099_v63 = vld [vmem:[%s1095_s6 + $0x48] sm:$0xff]  ;;  %v1194_v33 = vld [vmem:[%s4198_s20 + $0x10] sm:$0xff] }
 0x395   : > { %2501 = vmatprep.mubr.msk.f32.mxu1 %vm1248_vm14, %v1196_v45  ;;  %v1096_v49 = vld [vmem:[%s1095_s6] sm:$0xff]  ;;  %v1193_v31 = vld [vmem:[%s4198_s20 + $0x8] sm:$0xff]  ;;  %v1198_v2 = vld [vmem:[%s4198_s20 + $0x30] sm:$0xff] }
 0x396   : > { %v1197_v32 = vld [vmem:[%s4198_s20 + $0x28] sm:$0xff]  ;;  %v1195_v34 = vld [vmem:[%s4198_s20 + $0x18] sm:$0xff] }
 0x397   : > { %1143 = vperm.xlu1 %2750, %v1133_v10   ;;  %1138 = vperm.xlu0 %2749, %v1132_v35   ;;  %v1199_v10 = vld [vmem:[%s4198_s20 + $0x38] sm:$0xff]  ;;  %v2957_v35 = vmov 3  }
 0x39b   : > { %1171 = vperm.xlu1 %2750, %v1161_v3   ;;  %1166 = vperm.xlu0 %2749, %v1160_v15  }
 0x39f   : > { %1153 = vperm.xlu1 %2750, %v1135_v9   ;;  %1148 = vperm.xlu0 %2749, %v1134_v36   ;;  %v1378_v9 = vlaneseq }
 0x3a3   : > { %1181 = vperm.xlu1 %2750, %v1163_v39   ;;  %1176 = vperm.xlu0 %2749, %v1162_v27   ;;  %v1379_v27 = vand.u32 127, %v1378_v9 }
 0x3a7   : > { %1215 = vperm.xlu1 %2750, %v1201_v14   ;;  %1210 = vperm.xlu0 %2749, %v1200_v40   ;;  %v1380_v14 = vstv %s2369_s19  ;;  %s2959_s19 = smov 1  }
 0x3a8   : > { %v1381_v40 = vadd.s32 %v1380_v14, %v1379_v27 }
 0x3aa   : > { %vm1382_vm15 = vcmp.lt.s32.totalorder %v1381_v40, 300 }
 0x3ab   : > { %1225 = vperm.xlu1 %2750, %v1203_v41   ;;  %1220 = vperm.xlu0 %2749, %v1202_v42  }
 0x3af   : > { %1235 = vperm.xlu1 %2750, %v1205_v38   ;;  %1230 = vperm.xlu0 %2749, %v1204_v43  }
 0x3b3   : > { %1245 = vperm.xlu1 %2750, %v1207_v13   ;;  %1240 = vperm.xlu0 %2749, %v1206_v26  }
 0x3b7   : > { %1569 = vrot.lane.b32.xlu1 %v3586_v46, %s2956_s26  ;;  %1571 = vrot.lane.b32.xlu0 %v3588_v44, %s2956_s26 }
 0x3b8   : > { %2752 = vset.pattern.permute.xlu1 %v2957_v35  ;;  %2751 = vset.pattern.permute.xlu0 %v2957_v35 }
 0x3bb   : > { %1573 = vrot.lane.b32.xlu1 %v3594_v47, %s2956_s26 }
 0x40e   : > { %v1117_v48 = vpop.permute.xlu1 %1116  ;;  %v1107_v37 = vpop.permute.xlu0 %1106 }
 0x40f   : > { %v1124_v53 = vadd.f32 %v1107_v37, %v1096_v49  ;;  %v1126_v7 = vadd.f32 %v1117_v48, %v1098_v62 }
 0x411   : > { %v1128_v58 = vmax.f32 %v1124_v53, 0.0  ;;  %v1130_v61 = vmax.f32 %v1126_v7, 0.0 }
 0x412   : > { %v1122_v51 = vpop.permute.xlu1 %1121  ;;  %v1112_v52 = vpop.permute.xlu0 %1111 }
 0x413   : > { %v1125_v54 = vadd.f32 %v1112_v52, %v1097_v50  ;;  %v1127_v8 = vadd.f32 %v1122_v51, %v1099_v63 }
 0x415   : > { %v1129_v55 = vmax.f32 %v1125_v54, 0.0  ;;  %v1131_v59 = vmax.f32 %v1127_v8, 0.0 }
 0x416   : > { %v1144_v56 = vpop.permute.xlu1 %1143  ;;  %v1139_v57 = vpop.permute.xlu0 %1138 }
 0x417   : > { %v1157_v0 = vmul.f32 %v1144_v56, %v1129_v55  ;;  %v1156_v4 = vmul.f32 %v1139_v57, %v1128_v58 }
 0x41a   : > { %v1172_v5 = vpop.permute.xlu1 %1171  ;;  %v1167_v6 = vpop.permute.xlu0 %1166 }
 0x41b   : > { %v1185_v60 = vadd.f32 %v1172_v5, %v1157_v0  ;;  %v1184_v1 = vadd.f32 %v1167_v6, %v1156_v4 }
 0x41d   : > { %2757 = vtanh.f32 %v1185_v60  ;;  %v3666_v60 = vld [vmem:[#allocation2 + $0x18] sm:$0xff] }
 0x41e   : > { %2759 = vtanh.f32 %v1184_v1  ;;  %v1154_v11 = vpop.permute.xlu1 %1153  ;;  %v1149_v12 = vpop.permute.xlu0 %1148  ;;  %v3670_v1 = vld [vmem:[#allocation2 + $0x28] sm:$0xff] }
 0x41f   : > { %v1159_v17 = vmul.f32 %v1154_v11, %v1131_v59  ;;  %v1158_v18 = vmul.f32 %v1149_v12, %v1130_v61  ;;  %v3674_v11 = vld [vmem:[#allocation2 + $0x38] sm:$0xff]  ;;  %v3678_v12 = vld [vmem:[#allocation2 + $0x20] sm:$0xff]  ;;  %v3683_v61 = vld [vmem:[#allocation2 + $0x30] sm:$0xff]  ;;  %v2958_v59 = vmov 4  }
 0x422   : > { %v1182_v19 = vpop.permute.xlu1 %1181  ;;  %v1177_v20 = vpop.permute.xlu0 %1176 }
 0x423   : > { %v1187_v21 = vadd.f32 %v1182_v19, %v1159_v17  ;;  %v1186_v22 = vadd.f32 %v1177_v20, %v1158_v18 }
 0x425   : > { %2761 = vtanh.f32 %v1187_v21 }
 0x426   : > { %2763 = vtanh.f32 %v1186_v22  ;;  %v1216_v3 = vpop.permute.xlu1 %1215  ;;  %v1211_v15 = vpop.permute.xlu0 %1210 }
 0x427   : > { %v2758_v23 = vpop.eup %2757 }
 0x428   : > { %v2760_v24 = vpop.eup %2759 }
 0x429   : > { %v2563_v25 = vpack.c.bf16 %v2758_v23, %v2760_v24 }
 0x42a   : > { %v1226_v36 = vpop.permute.xlu1 %1225  ;;  %v1221_v39 = vpop.permute.xlu0 %1220 }
 0x42b   : > { %2564 = vmatprep.subr.bf16.mxu0 %v2563_v25  ;;  %2595 = vmatprep.subr.bf16.mxu1 %v2563_v25 }
 0x42c   : > { %2566 = vmatpush3.bf16.msra.mxu0 %v2563_v25  ;;  %2597 = vmatpush3.bf16.msra.mxu1 %v2563_v25 }
 0x42e   : > { %v1236_v41 = vpop.permute.xlu1 %1235  ;;  %v1231_v42 = vpop.permute.xlu0 %1230 }
 0x42f   : > { %v2762_v28 = vpop.eup %2761 }
 0x430   : > { %v2764_v29 = vpop.eup %2763 }
 0x431   : > { %v2567_v30 = vpack.c.bf16 %v2762_v28, %v2764_v29 }
 0x432   : > { %v1246_v49 = vpop.permute.xlu1 %1245  ;;  %v1241_v50 = vpop.permute.xlu0 %1240 }
 0x433   : > { %2568 = vmatprep.subr.bf16.mxu0 %v2567_v30  ;;  %2596 = vmatprep.subr.bf16.mxu1 %v2567_v30 }
 0x434   : > { %2570 = vmatpush3.bf16.msra.mxu0 %v2567_v30  ;;  %2598 = vmatpush3.bf16.msra.mxu1 %v2567_v30 }
 0x436   : > { %v3688_v17 = vpop.permute.xlu1 %1569  ;;  %v3692_v19 = vpop.permute.xlu0 %1571 }
 0x437   : > { %2496 = vmatmul.mubr.msk.f32.vlgmr.msra.gmra.mrb[0].mxu0 %vm1248_vm14, %v1193_v31  ;;  %2502 = vmatmul.mubr.msk.f32.vlgmr.msra.gmra.mrb[0].mxu1 %vm1248_vm14, %v1197_v32 }
 0x438   : > { %2498 = vmatprep.mubr.msk.f32.mxu0 %vm1248_vm14, %v1194_v33  ;;  %2504 = vmatprep.mubr.msk.f32.mxu1 %vm1248_vm14, %v1198_v2 }
 0x43a   : > { %v3690_v18 = vpop.permute.xlu1 %1573 }
 0x43b   : > { %2499 = vmatmul.mubr.msk.f32.gmra.mrb[2].mxu0 %vm1248_vm14, %v1195_v34  ;;  %2505 = vmatmul.mubr.msk.f32.gmra.mrb[2].mxu1 %vm1248_vm14, %v1199_v10 }
 0x50a   : > { %v2497_v38 = vpop.f32.mrb[0].mxu0  ;;  %v2503_v43 = vpop.f32.mrb[0].mxu1 }
 0x50b   : > { %v1345_v13 = vadd.f32 %v2497_v38, %v1216_v3  ;;  %v1365_v26 = vadd.f32 %v2503_v43, %v1236_v41  ;;  %v1339_v16 = vpop.f32.mrb[1].mxu0  ;;  %v1359_v45 = vpop.f32.mrb[1].mxu1 }
 0x50c   : > { %v1340_v48 = vadd.f32 %v1339_v16, %v1211_v15  ;;  %v1360_v37 = vadd.f32 %v1359_v45, %v1231_v42 }
 0x50d   : > { %v3635_v51 = vsel %vm1382_vm15, %v1365_v26, -1e+30  ;;  %v3638_v52 = vsel %vm1382_vm15, %v1345_v13, -1e+30 }
 0x50e   : > { %1411 = vmax.xlane.f32.xlu0 %v3635_v51  ;;  %v2506_v53 = vpop.f32.mrb[2].mxu1  ;;  %1403 = vmax.xlane.f32.xlu1 %v3638_v52  ;;  %v2500_v54 = vpop.f32.mrb[2].mxu0  ;;  %v3643_v55 = vsel %vm1382_vm15, %v1360_v37, -1e+30  ;;  %v3646_v56 = vsel %vm1382_vm15, %v1340_v48, -1e+30 }
 0x50f   : > { %v1375_v57 = vadd.f32 %v2506_v53, %v1246_v49  ;;  %v1355_v58 = vadd.f32 %v2500_v54, %v1226_v36  ;;  %v1349_v62 = vpop.f32.mrb[3].mxu0  ;;  %v1369_v63 = vpop.f32.mrb[3].mxu1 }
 0x510   : > { %v1350_v0 = vadd.f32 %v1349_v62, %v1221_v39  ;;  %v1370_v4 = vadd.f32 %v1369_v63, %v1241_v50 }
 0x511   : > { %v3649_v5 = vsel %vm1382_vm15, %v1355_v58, -1e+30  ;;  %v3652_v6 = vsel %vm1382_vm15, %v1375_v57, -1e+30 }
 0x512   : > { %1409 = vmax.xlane.f32.xlu1 %v3643_v55  ;;  %1401 = vmax.xlane.f32.xlu0 %v3646_v56  ;;  %v3657_v7 = vsel %vm1382_vm15, %v1370_v4, -1e+30  ;;  %v3660_v8 = vsel %vm1382_vm15, %v1350_v0, -1e+30 }
 0x516   : > { %1413 = vmax.xlane.f32.xlu1 %v3657_v7  ;;  %1407 = vmax.xlane.f32.xlu0 %v3649_v5 }
 0x51a   : > { %1415 = vmax.xlane.f32.xlu0 %v3652_v6 }
 0x51e   : > { %1405 = vmax.xlane.f32.xlu0 %v3660_v8 }
 0x527   : > { %1575 = vrot.lane.b32.xlu1 %v3666_v60, %s2956_s26 }
 0x52b   : > { %1579 = vrot.lane.b32.xlu1 %v3670_v1, %s2956_s26 }
 0x52f   : > { %1583 = vrot.lane.b32.xlu1 %v3674_v11, %s2956_s26 }
 0x533   : > { %1520 = vperm.xlu1 %2752, %v3588_v44  }
 0x534   : > { %1577 = vrot.lane.b32.xlu0 %v3678_v12, %s2956_s26 }
 0x537   : > { %2754 = vset.pattern.permute.xlu1 %v2958_v59 }
 0x538   : > { %1581 = vrot.lane.b32.xlu0 %v3683_v61, %s2956_s26  ;;  %s3756_s26 = scalar_lea.vmem [#allocation4], %s2370_s5  ;;  %s2961_s5 = smov 2  }
 0x53c   : > { %1515 = vperm.xlu0 %2751, %v3586_v46  }
 0x540   : > { %2753 = vset.pattern.permute.xlu0 %v2958_v59 }
 0x59b   : > { %v1412_v20 = vpop.xlane.xlu0 %1411  ;;  %v1404_v21 = vpop.xlane.xlu1 %1403 }
 0x59c   : > { %v3695_v22 = vmax.f32 %v3670_v1, %v1412_v20  ;;  %v3698_v23 = vmax.f32 %v3588_v44, %v1404_v21 }
 0x59e   : > { %1476 = vperm.xlu1 %2754, %v3695_v22   ;;  %1456 = vperm.xlu0 %2753, %v3698_v23  }
 0x59f   : > { %v1402_v24 = vpop.xlane.xlu0 %1401  ;;  %v1410_v28 = vpop.xlane.xlu1 %1409 }
 0x5a0   : > { %v3703_v25 = vmax.f32 %v3586_v46, %v1402_v24  ;;  %v3709_v30 = vmax.f32 %v3678_v12, %v1410_v28  ;;  %v1088_v24 = vld [vmem:[%s3756_s26 + $0x30] sm:$0xff]  ;;  %v1090_v28 = vld [vmem:[%s3756_s26 + $0x60] sm:$0xff] }
 0x5a2   : > { %1451 = vperm.xlu1 %2754, %v3703_v25   ;;  %2756 = vset.pattern.permute.xlu0 %v2957_v35 }
 0x5a3   : > { %v1408_v29 = vpop.xlane.xlu0 %1407  ;;  %1530 = vperm.xlu0 %2756, %v3666_v60   ;;  %v1414_v10 = vpop.xlane.xlu1 %1413 }
 0x5a4   : > { %v3714_v32 = vmax.f32 %v3666_v60, %v1408_v29  ;;  %v3726_v3 = vmax.f32 %v3683_v61, %v1414_v10 }
 0x5a6   : > { %1471 = vperm.xlu1 %2754, %v3709_v30  }
 0x5a7   : > { %v1416_v31 = vpop.xlane.xlu0 %1415  ;;  %1540 = vperm.xlu0 %2756, %v3670_v1   ;;  %v3732_v15 = vpop.permute.xlu1 %1575 }
 0x5a8   : > { %v3718_v33 = vmax.f32 %v3674_v11, %v1416_v31 }
 0x5aa   : > { %1466 = vperm.xlu1 %2754, %v3714_v32  }
 0x5ab   : > { %v1406_v2 = vpop.xlane.xlu0 %1405  ;;  %v3736_v36 = vpop.permute.xlu1 %1579 }
 0x5ac   : > { %v3722_v34 = vmax.f32 %v3594_v47, %v1406_v2 }
 0x5ae   : > { %1486 = vperm.xlu1 %2754, %v3718_v33  }
 0x5af   : > { %v3734_v9 = vpop.permute.xlu0 %1577  ;;  %v3740_v27 = vpop.permute.xlu1 %1583 }
 0x5b2   : > { %1461 = vperm.xlu1 %2754, %v3722_v34  }
 0x5b3   : > { %v3738_v39 = vpop.permute.xlu0 %1581  ;;  %v3742_v14 = vpop.permute.xlu1 %1520 }
 0x5b6   : > { %1481 = vperm.xlu1 %2754, %v3726_v3  }
 0x5ba   : > { %2755 = vset.pattern.permute.xlu1 %v2957_v35 }
 0x5bb   : > { %1525 = vperm.xlu1 %2755, %v3594_v47   ;;  %v3744_v40 = vpop.permute.xlu0 %1515 }
 0x5bf   : > { %1535 = vperm.xlu1 %2755, %v3678_v12  }
 0x61d   : > { %v1477_v41 = vpop.permute.xlu1 %1476  ;;  %v1457_v35 = vpop.permute.xlu0 %1456 }
 0x61e   : > { %v1490_v42 = vsub.f32 %v3638_v52, %v1457_v35  ;;  %v1494_v38 = vsub.f32 %v3635_v51, %v1477_v41 }
 0x620   : > { %v1499_v43 = vmul.f32 1.442695, %v1490_v42  ;;  %v1507_v16 = vmul.f32 1.442695, %v1494_v38 }
 0x621   : > { %v1452_v13 = vpop.permute.xlu1 %1451 }
 0x622   : > { %v1489_v26 = vsub.f32 %v3646_v56, %v1452_v13  ;;  %2765 = vpow2.f32 %v1499_v43  ;;  %v1087_v43 = vld [vmem:[%s3756_s26 + $0x18] sm:$0xff] }
 0x623   : > { %v3768_v13 = vsub.f32 %v1087_v43, %v3742_v14  ;;  %v1089_v14 = vld [vmem:[%s3756_s26 + $0x48] sm:$0xff] }
 0x624   : > { %v1497_v45 = vmul.f32 1.442695, %v1489_v26  ;;  %v1531_v26 = vpop.permute.xlu0 %1530 }
 0x625   : > { %v1472_v48 = vpop.permute.xlu1 %1471 }
 0x626   : > { %2767 = vpow2.f32 %v1497_v45  ;;  %v1493_v37 = vsub.f32 %v3643_v55, %v1472_v48  ;;  %v1086_v45 = vld [vmem:[%s3756_s26] sm:$0xff] }
 0x627   : > { %2769 = vpow2.f32 %v1507_v16 }
 0x628   : > { %v1505_v49 = vmul.f32 1.442695, %v1493_v37  ;;  %v1541_v48 = vpop.permute.xlu0 %1540  ;;  %v1091_v37 = vld [vmem:[%s3756_s26 + $0x78] sm:$0xff] }
 0x629   : > { %v1467_v50 = vpop.permute.xlu1 %1466 }
 0x62a   : > { %2771 = vpow2.f32 %v1505_v49  ;;  %v1492_v53 = vsub.f32 %v3649_v5, %v1467_v50  ;;  %v3777_v49 = vsub.f32 %v1086_v45, %v3744_v40  ;;  %v3779_v50 = vsub.f32 %v1091_v37, %v1541_v48 }
 0x62b   : > { %v1432_v37 = vsub.f32 %v3674_v11, %v3718_v33 }
 0x62c   : > { %v1503_v52 = vmul.f32 1.442695, %v1492_v53  ;;  %v2766_v54 = vpop.eup %2765 }
 0x62d   : > { %v1487_v51 = vpop.permute.xlu1 %1486  ;;  %1603 = vadd.xlane.f32.xlu0 %v2766_v54  ;;  %v3771_v16 = vmul.f32 %v2766_v54, %v3768_v13 }
 0x62e   : > { %2773 = vpow2.f32 %v1503_v52  ;;  %v1496_v57 = vsub.f32 %v3652_v6, %v1487_v51  ;;  %v3786_v52 = vsub.f32 %v1089_v14, %v1531_v26  ;;  %v1430_v26 = vsub.f32 %v3670_v1, %v3695_v22 }
 0x630   : > { %v2768_v56 = vpop.eup %2767  ;;  %v1511_v58 = vmul.f32 1.442695, %v1496_v57  ;;  %v1443_v48 = vmul.f32 1.442695, %v1430_v26 }
 0x631   : > { %v2770_v62 = vpop.eup %2769  ;;  %1601 = vadd.xlane.f32.xlu1 %v2768_v56  ;;  %v1462_v63 = vpop.permute.xlu1 %1461  ;;  %v3782_v53 = vmul.f32 %v2768_v56, %v3777_v49 }
 0x632   : > { %2775 = vpow2.f32 %v1511_v58  ;;  %v1491_v55 = vsub.f32 %v3660_v8, %v1462_v63  ;;  %1611 = vadd.xlane.f32.xlu0 %v2770_v62  ;;  %v3789_v54 = vmul.f32 %v2770_v62, %v3779_v50  ;;  %v1425_v62 = vsub.f32 %v3586_v46, %v3703_v25 }
 0x633   : > { %v1426_v46 = vsub.f32 %v3588_v44, %v3698_v23  ;;  %v1428_v44 = vsub.f32 %v3666_v60, %v3714_v32 }
 0x634   : > { %v2772_v0 = vpop.eup %2771  ;;  %v1501_v4 = vmul.f32 1.442695, %v1491_v55 }
 0x635   : > { %1609 = vadd.xlane.f32.xlu1 %v2772_v0  ;;  %v1482_v5 = vpop.permute.xlu1 %1481 }
 0x636   : > { %2777 = vpow2.f32 %v1501_v4  ;;  %v1495_v59 = vsub.f32 %v3657_v7, %v1482_v5  ;;  %v1093_v4 = vld [vmem:[%s3756_s26 + $0xa8] sm:$0xff]  ;;  %v1429_v5 = vsub.f32 %v3678_v12, %v3709_v30 }
 0x638   : > { %v2774_v20 = vpop.eup %2773  ;;  %v1509_v6 = vmul.f32 1.442695, %v1495_v59 }
 0x639   : > { %1607 = vadd.xlane.f32.xlu0 %v2774_v20  ;;  %v3793_v40 = vmul.f32 %v2774_v20, %v3786_v52 }
 0x63a   : > { %2779 = vpow2.f32 %v1509_v6  ;;  %v1526_v21 = vpop.permute.xlu1 %1525  ;;  %v1433_v6 = vmul.f32 1.442695, %v1425_v62 }
 0x63b   : > { %v1555_v29 = vsub.f32 %v1088_v24, %v1526_v21  ;;  %v1092_v24 = vld [vmem:[%s3756_s26 + $0x90] sm:$0xff] }
 0x63c   : > { %v2776_v8 = vpop.eup %2775  ;;  %2781 = vpow2.f32 %v1433_v6 }
 0x63d   : > { %1615 = vadd.xlane.f32.xlu0 %v2776_v8 }
 0x63e   : > { %v1536_v31 = vpop.permute.xlu1 %1535 }
 0x63f   : > { %v1557_v2 = vsub.f32 %v1090_v28, %v1536_v31 }
 0x640   : > { %v2778_v7 = vpop.eup %2777 }
 0x641   : > { %1605 = vadd.xlane.f32.xlu1 %v2778_v7  ;;  %v1565_v10 = vmul.f32 %v2772_v0, %v1557_v2  ;;  %v1563_v41 = vmul.f32 %v2778_v7, %v1555_v29 }
 0x643   : > { %v3760_v35 = vmul.f32 %v1563_v41, %v1555_v29  ;;  %v3762_v42 = vmul.f32 %v1565_v10, %v1557_v2  ;;  %v1441_v29 = vmul.f32 1.442695, %v1429_v5  ;;  %v1427_v2 = vsub.f32 %v3594_v47, %v3722_v34 }
 0x644   : > { %v2780_v38 = vpop.eup %2779  ;;  %v1435_v47 = vmul.f32 1.442695, %v1426_v46 }
 0x645   : > { %1613 = vadd.xlane.f32.xlu1 %v2780_v38  ;;  %2783 = vpow2.f32 %v1441_v29  ;;  %v1437_v43 = vmul.f32 1.442695, %v1427_v2 }
 0x647   : > { %2785 = vpow2.f32 %v1437_v43 }
 0x648   : > { %2787 = vpow2.f32 %v1435_v47 }
 0x653   : > { %1550 = vperm.xlu0 %2756, %v3674_v11  }
 0x656   : > { %1545 = vperm.xlu1 %2755, %v3683_v61  }
 0x672   : > { %1716 = vadd.xlane.f32.xlu0 %v3771_v16 }
 0x676   : > { %1722 = vadd.xlane.f32.xlu0 %v1565_v10 }
 0x67a   : > { %1718 = vadd.xlane.f32.xlu0 %v1563_v41  ;;  %1714 = vadd.xlane.f32.xlu1 %v3782_v53  ;;  %v1431_v41 = vsub.f32 %v3683_v61, %v3726_v3  ;;  %v1439_v61 = vmul.f32 1.442695, %v1428_v44 }
 0x67c   : > { %v1445_v45 = vmul.f32 1.442695, %v1431_v41 }
 0x67e   : > { %1724 = vadd.xlane.f32.xlu1 %v3789_v54  ;;  %2789 = vpow2.f32 %v1445_v45 }
 0x67f   : > { %2791 = vpow2.f32 %v1443_v48 }
 0x680   : > { %2793 = vpow2.f32 %v1439_v61 }
 0x682   : > { %1720 = vadd.xlane.f32.xlu1 %v3793_v40 }
 0x6ba   : > { %v1604_v51 = vpop.xlane.xlu0 %1603 }
 0x6be   : > { %v1602_v57 = vpop.xlane.xlu1 %1601 }
 0x6bf   : > { %v3796_v56 = vpop.xlane.xlu0 %1611 }
 0x6c2   : > { %v1610_v63 = vpop.xlane.xlu1 %1609 }
 0x6c6   : > { %v3798_v58 = vpop.xlane.xlu0 %1607 }
 0x6ca   : > { %v3800_v55 = vpop.xlane.xlu0 %1615 }
 0x6ce   : > { %v1606_v0 = vpop.xlane.xlu1 %1605 }
 0x6d2   : > { %v1614_v59 = vpop.xlane.xlu1 %1613  ;;  %v1551_v20 = vpop.permute.xlu0 %1550 }
 0x6d3   : > { %v1560_v21 = vsub.f32 %v1093_v4, %v1551_v20  ;;  %v1447_v4 = vmul.f32 1.442695, %v1432_v37 }
 0x6d5   : > { %v1568_v28 = vmul.f32 %v2776_v8, %v1560_v21  ;;  %2795 = vpow2.f32 %v1447_v4 }
 0x6d6   : > { %v1546_v31 = vpop.permute.xlu1 %1545 }
 0x6d7   : > { %v1559_v7 = vsub.f32 %v1092_v24, %v1546_v31  ;;  %v3810_v10 = vmul.f32 %v1568_v28, %v1560_v21  ;;  %1728 = vadd.xlane.f32.xlu1 %v1568_v28 }
 0x6d9   : > { %v1567_v12 = vmul.f32 %v2780_v38, %v1559_v7  ;;  %v3822_v38 = vpop.eup %2781 }
 0x6da   : > { %v1593_v14 = vmul.f32 %v3822_v38, %v3688_v17  ;;  %v3828_v1 = vpop.eup %2783 }
 0x6db   : > { %1726 = vadd.xlane.f32.xlu0 %v1567_v12  ;;  %v3816_v8 = vmul.f32 %v1567_v12, %v1559_v7  ;;  %v1597_v5 = vmul.f32 %v3828_v1, %v3734_v9  ;;  %v3832_v60 = vpop.eup %2785 }
 0x6dc   : > { %v1617_v62 = vadd.f32 %v1602_v57, %v1593_v14  ;;  %v3834_v20 = vpop.eup %2787  ;;  %v1595_v11 = vmul.f32 %v3832_v60, %v3690_v18 }
 0x6dd   : > { %v1621_v6 = vadd.f32 %v1610_v63, %v1597_v5  ;;  %v3838_v17 = vpop.eup %2789  ;;  %v1594_v57 = vmul.f32 %v3834_v20, %v3692_v19  ;;  %v1830_v5 = vmul.f32 %v3793_v40, %v3786_v52 }
 0x6de   : > { %v3842_v21 = vpop.eup %2791  ;;  %v1619_v9 = vadd.f32 %v1606_v0, %v1595_v11  ;;  %v1599_v28 = vmul.f32 %v3838_v17, %v3738_v39 }
 0x6df   : > { %v1618_v24 = vadd.f32 %v1604_v51, %v1594_v57  ;;  %v1598_v63 = vmul.f32 %v3842_v21, %v3736_v36  ;;  %v3848_v29 = vpop.eup %2793 }
 0x6e0   : > { %v1623_v18 = vadd.f32 %v1614_v59, %v1599_v28  ;;  %v1596_v19 = vmul.f32 %v3848_v29, %v3732_v15  ;;  %v3853_v0 = vpop.eup %2795  ;;  %v1827_v59 = vmul.f32 %v3782_v53, %v3777_v49 }
 0x6e1   : > { %v1622_v31 = vadd.f32 %v3796_v56, %v1598_v63  ;;  %v1600_v39 = vmul.f32 %v3853_v0, %v3740_v27  ;;  %v1828_v56 = vmul.f32 %v3771_v16, %v3768_v13 }
 0x6e2   : > { %v1620_v51 = vadd.f32 %v3798_v58, %v1596_v19 }
 0x6e3   : > { %v1624_v36 = vadd.f32 %v3800_v55, %v1600_v39 }
 0x6e8   : > { %1633 = vrot.lane.b32.xlu1 %v1617_v62, %s2959_s19 }
 0x6ec   : > { %1641 = vrot.lane.b32.xlu1 %v1621_v6, %s2959_s19 }
 0x6f0   : > { %1637 = vrot.lane.b32.xlu1 %v1619_v9, %s2959_s19 }
 0x6f1   : > { %1635 = vrot.lane.b32.xlu0 %v1618_v24, %s2959_s19 }
 0x6f4   : > { %1645 = vrot.lane.b32.xlu1 %v1623_v18, %s2959_s19 }
 0x6f5   : > { %1643 = vrot.lane.b32.xlu0 %v1622_v31, %s2959_s19 }
 0x6f9   : > { %1639 = vrot.lane.b32.xlu0 %v1620_v51, %s2959_s19 }
 0x6fd   : > { %1647 = vrot.lane.b32.xlu0 %v1624_v36, %s2959_s19 }
 0x6ff   : > { %v1717_v2 = vpop.xlane.xlu0 %1716 }
 0x703   : > { %v1723_v46 = vpop.xlane.xlu0 %1722 }
 0x707   : > { %v1715_v15 = vpop.xlane.xlu1 %1714  ;;  %v3865_v12 = vpop.xlane.xlu0 %1718 }
 0x70b   : > { %v1725_v7 = vpop.xlane.xlu1 %1724 }
 0x70f   : > { %v3863_v58 = vpop.xlane.xlu1 %1720 }
 0x718   : > { %1835 = vadd.xlane.f32.xlu1 %v1827_v59 }
 0x71c   : > { %1837 = vadd.xlane.f32.xlu0 %v1828_v56 }
 0x764   : > { %v3867_v27 = vpop.xlane.xlu1 %1728 }
 0x768   : > { %v3869_v55 = vpop.xlane.xlu0 %1726  ;;  %v1634_v41 = vpop.permute.xlu1 %1633 }
 0x769   : > { %1658 = vst.msk [vmem:[#allocation2] sm:$0xff] %vm1657_vm0, %v1634_v41 }
 0x76c   : > { %v1636_v49 = vpop.permute.xlu0 %1635  ;;  %v1642_v53 = vpop.permute.xlu1 %1641 }
 0x76d   : > { %1659 = vst.msk [vmem:[#allocation2 + $0x8] sm:$0xff] %vm1657_vm0, %v1636_v49  ;;  %1662 = vst.msk [vmem:[#allocation2 + $0x20] sm:$0xff] %vm1657_vm0, %v1642_v53 }
 0x770   : > { %v1644_v13 = vpop.permute.xlu0 %1643  ;;  %v1638_v16 = vpop.permute.xlu1 %1637  ;;  %v1666_v61 = vld [vmem:[#allocation2] sm:$0xff] }
 0x771   : > { %1663 = vst.msk [vmem:[#allocation2 + $0x28] sm:$0xff] %vm1657_vm0, %v1644_v13  ;;  %1660 = vst.msk [vmem:[#allocation2 + $0x10] sm:$0xff] %vm1657_vm0, %v1638_v16 }
 0x774   : > { %v1640_v43 = vpop.permute.xlu0 %1639  ;;  %v1646_v26 = vpop.permute.xlu1 %1645  ;;  %v1667_v47 = vld [vmem:[#allocation2 + $0x8] sm:$0xff]  ;;  %v1670_v44 = vld [vmem:[#allocation2 + $0x20] sm:$0xff] }
 0x775   : > { %1661 = vst.msk [vmem:[#allocation2 + $0x18] sm:$0xff] %vm1657_vm0, %v1640_v43  ;;  %1664 = vst.msk [vmem:[#allocation2 + $0x30] sm:$0xff] %vm1657_vm0, %v1646_v26  ;;  %1684 = vrot.lane.b32.xlu1 %v1667_v47, %s2960_s15 }
 0x778   : > { %v1648_v45 = vpop.permute.xlu0 %1647  ;;  %v1671_v48 = vld [vmem:[#allocation2 + $0x28] sm:$0xff]  ;;  %v1668_v37 = vld [vmem:[#allocation2 + $0x10] sm:$0xff] }
 0x779   : > { %1665 = vst.msk [vmem:[#allocation2 + $0x38] sm:$0xff] %vm1657_vm0, %v1648_v45  ;;  %1692 = vrot.lane.b32.xlu0 %v1671_v48, %s2960_s15  ;;  %1690 = vrot.lane.b32.xlu1 %v1670_v44, %s2960_s15 }
 0x77c   : > { %v1669_v14 = vld [vmem:[#allocation2 + $0x18] sm:$0xff]  ;;  %v1672_v62 = vld [vmem:[#allocation2 + $0x30] sm:$0xff] }
 0x77d   : > { %1682 = vrot.lane.b32.xlu0 %v1666_v61, %s2960_s15  ;;  %1686 = vrot.lane.b32.xlu1 %v1668_v37, %s2960_s15 }
 0x780   : > { %v1673_v4 = vld [vmem:[#allocation2 + $0x38] sm:$0xff] }
 0x781   : > { %1688 = vrot.lane.b32.xlu0 %v1669_v14, %s2960_s15  ;;  %1694 = vrot.lane.b32.xlu1 %v1672_v62, %s2960_s15 }
 0x785   : > { %1696 = vrot.lane.b32.xlu0 %v1673_v4, %s2960_s15 }
 0x7a4   : > { %1839 = vadd.xlane.f32.xlu0 %v3760_v35 }
 0x7a5   : > { %1841 = vadd.xlane.f32.xlu1 %v1830_v5  ;;  %v3882_v6 = vpop.xlane.xlu1 %1835 }
 0x7a9   : > { %v3884_v11 = vpop.xlane.xlu0 %1837 }
 0x7e7   : > { %v1685_v57 = vpop.permute.xlu1 %1684 }
 0x7e8   : > { %v1707_v9 = vmul.f32 %v3834_v20, %v1685_v57 }
 0x7ea   : > { %v1731_v24 = vadd.f32 %v1717_v2, %v1707_v9 }
 0x7eb   : > { %v1693_v28 = vpop.permute.xlu0 %1692  ;;  %v1691_v63 = vpop.permute.xlu1 %1690 }
 0x7ec   : > { %v1711_v18 = vmul.f32 %v3842_v21, %v1693_v28  ;;  %1748 = vrot.lane.b32.xlu0 %v1731_v24, %s2961_s5  ;;  %v1710_v40 = vmul.f32 %v3828_v1, %v1691_v63 }
 0x7ee   : > { %v1735_v31 = vadd.f32 %v1725_v7, %v1711_v18  ;;  %v1734_v59 = vadd.f32 %v1723_v46, %v1710_v40 }
 0x7ef   : > { %v1683_v19 = vpop.permute.xlu0 %1682  ;;  %v1687_v35 = vpop.permute.xlu1 %1686 }
 0x7f0   : > { %v1706_v52 = vmul.f32 %v3822_v38, %v1683_v19  ;;  %1756 = vrot.lane.b32.xlu0 %v1735_v31, %s2961_s5  ;;  %v1708_v56 = vmul.f32 %v3832_v60, %v1687_v35 }
 0x7f2   : > { %v1730_v51 = vadd.f32 %v1715_v15, %v1706_v52  ;;  %v1732_v53 = vadd.f32 %v3865_v12, %v1708_v56 }
 0x7f3   : > { %v1689_v39 = vpop.permute.xlu0 %1688  ;;  %v1695_v41 = vpop.permute.xlu1 %1694 }
 0x7f4   : > { %v1709_v36 = vmul.f32 %v3848_v29, %v1689_v39  ;;  %1746 = vrot.lane.b32.xlu1 %v1730_v51, %s2961_s5  ;;  %v1712_v13 = vmul.f32 %v3838_v17, %v1695_v41 }
 0x7f6   : > { %v1733_v2 = vadd.f32 %v3863_v58, %v1709_v36  ;;  %v1736_v46 = vadd.f32 %v3869_v55, %v1712_v13  ;;  %v1832_v58 = vmul.f32 %v3789_v54, %v3779_v50 }
 0x7f7   : > { %v1697_v49 = vpop.permute.xlu0 %1696 }
 0x7f8   : > { %v1713_v7 = vmul.f32 %v3853_v0, %v1697_v49  ;;  %1752 = vrot.lane.b32.xlu0 %v1733_v2, %s2961_s5  ;;  %1754 = vrot.lane.b32.xlu1 %v1734_v59, %s2961_s5 }
 0x7fa   : > { %v1737_v15 = vadd.f32 %v3867_v27, %v1713_v7 }
 0x7fc   : > { %1760 = vrot.lane.b32.xlu0 %v1737_v15, %s2961_s5  ;;  %1750 = vrot.lane.b32.xlu1 %v1732_v53, %s2961_s5 }
 0x800   : > { %1758 = vrot.lane.b32.xlu1 %v1736_v46, %s2961_s5 }
 0x81b   : > { %1843 = vadd.xlane.f32.xlu0 %v3762_v42 }
 0x81f   : > { %1847 = vadd.xlane.f32.xlu0 %v3816_v8 }
 0x824   : > { %1845 = vadd.xlane.f32.xlu1 %v1832_v58 }
 0x828   : > { %1849 = vadd.xlane.f32.xlu1 %v3810_v10 }
 0x831   : > { %v3903_v12 = vpop.xlane.xlu0 %1839 }
 0x832   : > { %v1842_v27 = vpop.xlane.xlu1 %1841 }
 0x85e   : > { %v1749_v16 = vpop.permute.xlu0 %1748 }
 0x85f   : > { %1772 = vst.msk [vmem:[#allocation2 + $0x8] sm:$0xff] %vm1770_vm1, %v1749_v16 }
 0x862   : > { %v1757_v43 = vpop.permute.xlu0 %1756 }
 0x863   : > { %1776 = vst.msk [vmem:[#allocation2 + $0x28] sm:$0xff] %vm1770_vm1, %v1757_v43 }
 0x866   : > { %v1747_v55 = vpop.permute.xlu1 %1746  ;;  %v1780_v42 = vld [vmem:[#allocation2 + $0x8] sm:$0xff] }
 0x867   : > { %1771 = vst.msk [vmem:[#allocation2] sm:$0xff] %vm1770_vm1, %v1747_v55  ;;  %1797 = vrot.lane.b32.xlu1 %v1780_v42, %s2962_s18 }
 0x86a   : > { %v1753_v50 = vpop.permute.xlu0 %1752  ;;  %v1755_v54 = vpop.permute.xlu1 %1754  ;;  %v1784_v8 = vld [vmem:[#allocation2 + $0x28] sm:$0xff] }
 0x86b   : > { %1774 = vst.msk [vmem:[#allocation2 + $0x18] sm:$0xff] %vm1770_vm1, %v1753_v50  ;;  %1775 = vst.msk [vmem:[#allocation2 + $0x20] sm:$0xff] %vm1770_vm1, %v1755_v54  ;;  %1805 = vrot.lane.b32.xlu0 %v1784_v8, %s2962_s18 }
 0x86e   : > { %v1761_v10 = vpop.permute.xlu0 %1760  ;;  %v1751_v26 = vpop.permute.xlu1 %1750  ;;  %v1779_v47 = vld [vmem:[#allocation2] sm:$0xff] }
 0x86f   : > { %1778 = vst.msk [vmem:[#allocation2 + $0x38] sm:$0xff] %vm1770_vm1, %v1761_v10  ;;  %1773 = vst.msk [vmem:[#allocation2 + $0x10] sm:$0xff] %vm1770_vm1, %v1751_v26  ;;  %1795 = vrot.lane.b32.xlu0 %v1779_v47, %s2962_s18 }
 0x872   : > { %v1759_v45 = vpop.permute.xlu1 %1758  ;;  %v1782_v48 = vld [vmem:[#allocation2 + $0x18] sm:$0xff]  ;;  %v1783_v44 = vld [vmem:[#allocation2 + $0x20] sm:$0xff] }
 0x873   : > { %1777 = vst.msk [vmem:[#allocation2 + $0x30] sm:$0xff] %vm1770_vm1, %v1759_v45  ;;  %1801 = vrot.lane.b32.xlu0 %v1782_v48, %s2962_s18  ;;  %1803 = vrot.lane.b32.xlu1 %v1783_v44, %s2962_s18 }
 0x876   : > { %v1786_v61 = vld [vmem:[#allocation2 + $0x38] sm:$0xff]  ;;  %v1781_v37 = vld [vmem:[#allocation2 + $0x10] sm:$0xff] }
 0x877   : > { %1809 = vrot.lane.b32.xlu0 %v1786_v61, %s2962_s18  ;;  %1799 = vrot.lane.b32.xlu1 %v1781_v37, %s2962_s18 }
 0x87a   : > { %v1785_v14 = vld [vmem:[#allocation2 + $0x30] sm:$0xff] }
 0x87b   : > { %1807 = vrot.lane.b32.xlu1 %v1785_v14, %s2962_s18 }
 0x8a8   : > { %v1844_v4 = vpop.xlane.xlu0 %1843 }
 0x8ac   : > { %v1848_v57 = vpop.xlane.xlu0 %1847 }
 0x8b1   : > { %v1846_v62 = vpop.xlane.xlu1 %1845 }
 0x8b5   : > { %v1850_v5 = vpop.xlane.xlu1 %1849 }
 0x8d9   : > { %v1798_v9 = vpop.permute.xlu1 %1797 }
 0x8da   : > { %v1820_v24 = vmul.f32 %v3834_v20, %v1798_v9 }
 0x8dc   : > { %v1852_v28 = vadd.f32 %v3884_v11, %v1820_v24 }
 0x8dd   : > { %v1806_v63 = vpop.permute.xlu0 %1805 }
 0x8de   : > { %v1824_v18 = vmul.f32 %v3842_v21, %v1806_v63  ;;  %1869 = vrot.lane.b32.xlu0 %v1852_v28, %s2963_s12 }
 0x8e0   : > { %v1856_v31 = vadd.f32 %v1846_v62, %v1824_v18 }
 0x8e1   : > { %v1796_v19 = vpop.permute.xlu0 %1795 }
 0x8e2   : > { %v1819_v52 = vmul.f32 %v3822_v38, %v1796_v19  ;;  %1877 = vrot.lane.b32.xlu0 %v1856_v31, %s2963_s12 }
 0x8e4   : > { %v1851_v35 = vadd.f32 %v3882_v6, %v1819_v52 }
 0x8e5   : > { %v1802_v40 = vpop.permute.xlu0 %1801  ;;  %v1804_v51 = vpop.permute.xlu1 %1803 }
 0x8e6   : > { %v1822_v39 = vmul.f32 %v3848_v29, %v1802_v40  ;;  %v1823_v20 = vmul.f32 %v3828_v1, %v1804_v51  ;;  %1867 = vrot.lane.b32.xlu1 %v1851_v35, %s2963_s12 }
 0x8e8   : > { %v1854_v11 = vadd.f32 %v1842_v27, %v1822_v39  ;;  %v1855_v36 = vadd.f32 %v1844_v4, %v1823_v20 }
 0x8e9   : > { %v1810_v59 = vpop.permute.xlu0 %1809  ;;  %v1800_v21 = vpop.permute.xlu1 %1799 }
 0x8ea   : > { %v1826_v56 = vmul.f32 %v3853_v0, %v1810_v59  ;;  %v1821_v2 = vmul.f32 %v3832_v60, %v1800_v21  ;;  %1873 = vrot.lane.b32.xlu0 %v1854_v11, %s2963_s12  ;;  %1875 = vrot.lane.b32.xlu1 %v1855_v36, %s2963_s12 }
 0x8ec   : > { %v1858_v38 = vadd.f32 %v1850_v5, %v1826_v56  ;;  %v1853_v6 = vadd.f32 %v3903_v12, %v1821_v2 }
 0x8ed   : > { %v1808_v41 = vpop.permute.xlu1 %1807 }
 0x8ee   : > { %v1825_v49 = vmul.f32 %v3838_v17, %v1808_v41  ;;  %1881 = vrot.lane.b32.xlu0 %v1858_v38, %s2963_s12  ;;  %1871 = vrot.lane.b32.xlu1 %v1853_v6, %s2963_s12 }
 0x8f0   : > { %v1857_v1 = vadd.f32 %v1848_v57, %v1825_v49 }
 0x8f2   : > { %1879 = vrot.lane.b32.xlu1 %v1857_v1, %s2963_s12 }
 0x950   : > { %v1870_v29 = vpop.permute.xlu0 %1869 }
 0x951   : > { %1893 = vst.msk [vmem:[#allocation2 + $0x8] sm:$0xff] %vm1891_vm2, %v1870_v29 }
 0x952   : > { %1902 = vst.msk [vmem:[#allocation2 + $0x8] sm:$0xff] %vm1900_vm3, %v3698_v23 }
 0x954   : > { %v1878_v60 = vpop.permute.xlu0 %1877 }
 0x955   : > { %1897 = vst.msk [vmem:[#allocation2 + $0x28] sm:$0xff] %vm1891_vm2, %v1878_v60 }
 0x956   : > { %1906 = vst.msk [vmem:[#allocation2 + $0x28] sm:$0xff] %vm1900_vm3, %v3695_v22 }
 0x958   : > { %v1868_v0 = vpop.permute.xlu1 %1867 }
 0x959   : > { %1892 = vst.msk [vmem:[#allocation2] sm:$0xff] %vm1891_vm2, %v1868_v0 }
 0x95a   : > { %1901 = vst.msk [vmem:[#allocation2] sm:$0xff] %vm1900_vm3, %v3703_v25 }
 0x95c   : > { %v1874_v17 = vpop.permute.xlu0 %1873  ;;  %v1876_v7 = vpop.permute.xlu1 %1875 }
 0x95d   : > { %1895 = vst.msk [vmem:[#allocation2 + $0x18] sm:$0xff] %vm1891_vm2, %v1874_v17  ;;  %1896 = vst.msk [vmem:[#allocation2 + $0x20] sm:$0xff] %vm1891_vm2, %v1876_v7 }
 0x95e   : > { %1904 = vst.msk [vmem:[#allocation2 + $0x18] sm:$0xff] %vm1900_vm3, %v3714_v32  ;;  %1905 = vst.msk [vmem:[#allocation2 + $0x20] sm:$0xff] %vm1900_vm3, %v3709_v30 }
 0x960   : > { %v1882_v23 = vpop.permute.xlu0 %1881  ;;  %v1872_v22 = vpop.permute.xlu1 %1871 }
 0x961   : > { %1899 = vst.msk [vmem:[#allocation2 + $0x38] sm:$0xff] %vm1891_vm2, %v1882_v23  ;;  %1894 = vst.msk [vmem:[#allocation2 + $0x10] sm:$0xff] %vm1891_vm2, %v1872_v22 }
 0x962   : > { %1908 = vst.msk [vmem:[#allocation2 + $0x38] sm:$0xff] %vm1900_vm3, %v3718_v33  ;;  %1903 = vst.msk [vmem:[#allocation2 + $0x10] sm:$0xff] %vm1900_vm3, %v3722_v34 }
 0x964   : > { %v1880_v25 = vpop.permute.xlu1 %1879 }
 0x965   : > { %1898 = vst.msk [vmem:[#allocation2 + $0x30] sm:$0xff] %vm1891_vm2, %v1880_v25 }
 0x966   : > { %1907 = vst.msk [vmem:[#allocation2 + $0x30] sm:$0xff] %vm1900_vm3, %v3726_v3 }
 0x967 PF: > { %p1909_p3 = scmp.eq.s32.totalorder %s2917_s30, 2 }
 0x969   : > { %p1910_p4 = pnand %p1909_p3, %p698_p10 }
 0x96a   : > { %v3951_v30 = vld [vmem:[#allocation2] sm:$0xff] (!%p1910_p4)  ;;  %v3953_v32 = vld [vmem:[#allocation2 + $0x10] sm:$0xff] (!%p1910_p4)  ;;  %v3955_v33 = vld [vmem:[#allocation2 + $0x8] sm:$0xff] (!%p1910_p4)  ;;  %s2964_s30 = smov (!%p1910_p4), 1   ;;  %s2965_s9 = smov (!%p1910_p4), 2  }
 0x96b   : > { %1913 = sbr.rel (%p1910_p4) target bundleno = 2822 (0xb06), region = 76  ;;  %2797 = vrcp.f32 (!%p1910_p4), %v3951_v30  ;;  %v3958_v34 = vld [vmem:[#allocation2 + $0x18] sm:$0xff] (!%p1910_p4)  ;;  %v3963_v3 = vld [vmem:[#allocation2 + $0x20] sm:$0xff] (!%p1910_p4)  ;;  %v3965_v53 = vld [vmem:[#allocation2 + $0x28] sm:$0xff] (!%p1910_p4)  ;;  %s2966_s11 = smov (!%p1910_p4), 125  }
 0x96c   : > { %2799 = vrcp.f32 (!%p1910_p4), %v3953_v32  ;;  %v3971_v15 = vld [vmem:[#allocation2 + $0x38] sm:$0xff] (!%p1910_p4)  ;;  %s2967_s10 = smov (!%p1910_p4), 121  }
 0x96d   : > { %2801 = vrcp.f32 (!%p1910_p4), %v3955_v33  ;;  %v3969_v13 = vld [vmem:[#allocation2 + $0x30] sm:$0xff] (!%p1910_p4) }
 0x96e   : > { %2803 = vrcp.f32 (!%p1910_p4), %v3958_v34 }
 0x96f   : > { %2805 = vrcp.f32 (!%p1910_p4), %v3963_v3 }
 0x970   : > { %2807 = vrcp.f32 (!%p1910_p4), %v3965_v53 }
 0x971   : > { %2809 = vrcp.f32 (!%p1910_p4), %v3969_v13 }
 0x972   : > { %2811 = vrcp.f32 %v3971_v15 }
 0x975   : > { %v2798_v46 = vpop.eup %2797 }
 0x976   : > { %v2800_v58 = vpop.eup %2799  ;;  %1946 = vrot.lane.b32.xlu0 %v2798_v46, %s2964_s30 }
 0x977   : > { %v2802_v12 = vpop.eup %2801  ;;  %1950 = vrot.lane.b32.xlu1 %v2800_v58, %s2964_s30 }
 0x978   : > { %v2804_v16 = vpop.eup %2803 }
 0x979   : > { %v2806_v27 = vpop.eup %2805 }
 0x97a   : > { %1948 = vrot.lane.b32.xlu0 %v2802_v12, %s2964_s30  ;;  %v2808_v43 = vpop.eup %2807 }
 0x97b   : > { %1952 = vrot.lane.b32.xlu1 %v2804_v16, %s2964_s30  ;;  %v2810_v55 = vpop.eup %2809 }
 0x97c   : > { %v2812_v42 = vpop.eup %2811 }
 0x97e   : > { %1954 = vrot.lane.b32.xlu0 %v2806_v27, %s2964_s30 }
 0x97f   : > { %1956 = vrot.lane.b32.xlu1 %v2808_v43, %s2964_s30 }
 0x982   : > { %1958 = vrot.lane.b32.xlu0 %v2810_v55, %s2964_s30 }
 0x983   : > { %1960 = vrot.lane.b32.xlu1 %v2812_v42, %s2964_s30 }
 0x986   : > { %1978 = vrot.lane.b32.xlu0 %v2798_v46, %s2965_s9 }
 0x987   : > { %1980 = vrot.lane.b32.xlu1 %v2802_v12, %s2965_s9 }
 0x98a   : > { %1982 = vrot.lane.b32.xlu0 %v2800_v58, %s2965_s9 }
 0x98b   : > { %1984 = vrot.lane.b32.xlu1 %v2804_v16, %s2965_s9 }
 0x98e   : > { %1986 = vrot.lane.b32.xlu0 %v2806_v27, %s2965_s9 }
 0x98f   : > { %1988 = vrot.lane.b32.xlu1 %v2808_v43, %s2965_s9 }
 0x992   : > { %1990 = vrot.lane.b32.xlu0 %v2810_v55, %s2965_s9 }
 0x993   : > { %1992 = vrot.lane.b32.xlu1 %v2812_v42, %s2965_s9 }
 0x9e8   : > { %v1947_v50 = vpop.permute.xlu0 %1946 }
 0x9e9   : > { %v1970_v54 = vmul.f32 %v1947_v50, %v3951_v30  ;;  %v1951_v8 = vpop.permute.xlu1 %1950 }
 0x9ea   : > { %v1972_v10 = vmul.f32 %v1951_v8, %v3953_v32 }
 0x9eb   : > { %v2010_v26 = vmul.f32 %v1970_v54, %v1970_v54 }
 0x9ec   : > { %v1949_v47 = vpop.permute.xlu0 %1948  ;;  %v2012_v45 = vmul.f32 %v1972_v10, %v1972_v10 }
 0x9ed   : > { %v1971_v48 = vmul.f32 %v1949_v47, %v3955_v33  ;;  %2026 = vrot.lane.b32.xlu0 %v2010_v26, %s2964_s30  ;;  %v1953_v44 = vpop.permute.xlu1 %1952 }
 0x9ee   : > { %v1973_v61 = vmul.f32 %v1953_v44, %v3958_v34 }
 0x9ef   : > { %v2011_v37 = vmul.f32 %v1971_v48, %v1971_v48 }
 0x9f0   : > { %v1955_v14 = vpop.permute.xlu0 %1954  ;;  %v2013_v62 = vmul.f32 %v1973_v61, %v1973_v61 }
 0x9f1   : > { %v1974_v4 = vmul.f32 %v1955_v14, %v3963_v3  ;;  %2030 = vrot.lane.b32.xlu0 %v2012_v45, %s2964_s30  ;;  %2028 = vrot.lane.b32.xlu1 %v2011_v37, %s2964_s30  ;;  %v1957_v5 = vpop.permute.xlu1 %1956 }
 0x9f2   : > { %v1975_v57 = vmul.f32 %v1957_v5, %v3965_v53 }
 0x9f3   : > { %v2014_v9 = vmul.f32 %v1974_v4, %v1974_v4 }
 0x9f4   : > { %v1959_v24 = vpop.permute.xlu0 %1958  ;;  %v2015_v28 = vmul.f32 %v1975_v57, %v1975_v57 }
 0x9f5   : > { %v1976_v63 = vmul.f32 %v1959_v24, %v3969_v13  ;;  %2032 = vrot.lane.b32.xlu1 %v2013_v62, %s2964_s30  ;;  %2034 = vrot.lane.b32.xlu0 %v2014_v9, %s2964_s30  ;;  %v1961_v18 = vpop.permute.xlu1 %1960 }
 0x9f6   : > { %v1977_v31 = vmul.f32 %v1961_v18, %v3971_v15 }
 0x9f7   : > { %v2016_v19 = vmul.f32 %v1976_v63, %v1976_v63 }
 0x9f8   : > { %v2017_v52 = vmul.f32 %v1977_v31, %v1977_v31  ;;  %v1979_v35 = vpop.permute.xlu0 %1978 }
 0x9f9   : > { %2036 = vrot.lane.b32.xlu1 %v2015_v28, %s2964_s30  ;;  %2038 = vrot.lane.b32.xlu0 %v2016_v19, %s2964_s30  ;;  %v1981_v40 = vpop.permute.xlu1 %1980  ;;  %v2002_v56 = vmul.f32 %v1979_v35, %v3951_v30 }
 0x9fa   : > { %v2003_v41 = vmul.f32 %v1981_v40, %v3955_v33 }
 0x9fc   : > { %v1983_v51 = vpop.permute.xlu0 %1982 }
 0x9fd   : > { %2040 = vrot.lane.b32.xlu1 %v2017_v52, %s2964_s30  ;;  %2074 = vrot.lane.b32.xlu0 %v1970_v54, %s2966_s11  ;;  %v1985_v39 = vpop.permute.xlu1 %1984  ;;  %v2004_v49 = vmul.f32 %v1983_v51, %v3953_v32 }
 0x9fe   : > { %v2005_v7 = vmul.f32 %v1985_v39, %v3958_v34 }
 0xa00   : > { %v1987_v20 = vpop.permute.xlu0 %1986 }
 0xa01   : > { %2076 = vrot.lane.b32.xlu1 %v1971_v48, %s2966_s11  ;;  %2078 = vrot.lane.b32.xlu0 %v1972_v10, %s2966_s11  ;;  %v1989_v11 = vpop.permute.xlu1 %1988  ;;  %v2006_v23 = vmul.f32 %v1987_v20, %v3963_v3 }
 0xa02   : > { %v2007_v27 = vmul.f32 %v1989_v11, %v3965_v53 }
 0xa04   : > { %v1991_v36 = vpop.permute.xlu0 %1990 }
 0xa05   : > { %2080 = vrot.lane.b32.xlu1 %v1973_v61, %s2966_s11  ;;  %2082 = vrot.lane.b32.xlu0 %v1974_v4, %s2966_s11  ;;  %v1993_v59 = vpop.permute.xlu1 %1992  ;;  %v2008_v43 = vmul.f32 %v1991_v36, %v3969_v13 }
 0xa06   : > { %v2009_v47 = vmul.f32 %v1993_v59, %v3971_v15 }
 0xa09   : > { %2084 = vrot.lane.b32.xlu1 %v1975_v57, %s2966_s11  ;;  %2086 = vrot.lane.b32.xlu0 %v1976_v63, %s2966_s11 }
 0xa0d   : > { %2088 = vrot.lane.b32.xlu1 %v1977_v31, %s2966_s11 }
 0xa5f   : > { %v2027_v21 = vpop.permute.xlu0 %2026 }
 0xa60   : > { %v2050_v6 = vsub.f32 %v2002_v56, %v2027_v21 }
 0xa62   : > { %v4010_v0 = vmax.f32 %v2050_v6, 1e-12 }
 0xa63   : > { %v2029_v2 = vpop.permute.xlu1 %2028  ;;  %v2031_v38 = vpop.permute.xlu0 %2030 }
 0xa64   : > { %v2051_v60 = vsub.f32 %v2003_v41, %v2029_v2  ;;  %v2052_v17 = vsub.f32 %v2004_v49, %v2031_v38  ;;  %2813 = vrsqrt.f32 %v4010_v0  ;;  %vm2149_vm4 = vcmp.eq.f32.partialorder %v4010_v0, inf }
 0xa65   : > { %vm2151_vm5 = vcmp.eq.f32.partialorder %v4010_v0, 0.0 }
 0xa66   : > { %v4014_v46 = vmax.f32 %v2051_v60, 1e-12  ;;  %v4017_v12 = vmax.f32 %v2052_v17, 1e-12 }
 0xa67   : > { %v2033_v1 = vpop.permute.xlu1 %2032  ;;  %v2035_v29 = vpop.permute.xlu0 %2034 }
 0xa68   : > { %v2053_v58 = vsub.f32 %v2005_v7, %v2033_v1  ;;  %v2054_v16 = vsub.f32 %v2006_v23, %v2035_v29  ;;  %2815 = vrsqrt.f32 %v4014_v46  ;;  %vm2156_vm6 = vcmp.eq.f32.partialorder %v4014_v46, inf }
 0xa69   : > { %2817 = vrsqrt.f32 %v4017_v12  ;;  %vm2163_vm7 = vcmp.eq.f32.partialorder %v4017_v12, inf  ;;  %v2159_v56 = vand.u32 2147483648, %v4014_v46  ;;  %v2166_v2 = vand.u32 2147483648, %v4017_v12 }
 0xa6a   : > { %v4022_v50 = vmax.f32 %v2053_v58, 1e-12  ;;  %v4026_v10 = vmax.f32 %v2054_v16, 1e-12  ;;  %vm2158_vm8 = vcmp.eq.f32.partialorder %v4014_v46, 0.0  ;;  %vm2165_vm9 = vcmp.eq.f32.partialorder %v4017_v12, 0.0 }
 0xa6b   : > { %v2037_v22 = vpop.permute.xlu1 %2036  ;;  %v2039_v25 = vpop.permute.xlu0 %2038 }
 0xa6c   : > { %v2055_v54 = vsub.f32 %v2007_v27, %v2037_v22  ;;  %v2056_v26 = vsub.f32 %v2008_v43, %v2039_v25  ;;  %2819 = vrsqrt.f32 %v4022_v50  ;;  %vm2170_vm10 = vcmp.eq.f32.partialorder %v4022_v50, inf }
 0xa6d   : > { %2821 = vrsqrt.f32 %v4026_v10  ;;  %vm2177_vm11 = vcmp.eq.f32.partialorder %v4026_v10, inf  ;;  %v2180_v17 = vand.u32 2147483648, %v4026_v10  ;;  %vm2172_vm12 = vcmp.eq.f32.partialorder %v4022_v50, 0.0 }
 0xa6e   : > { %v4031_v44 = vmax.f32 %v2055_v54, 1e-12  ;;  %v2814_v62 = vpop.eup %2813  ;;  %vm2179_vm13 = vcmp.eq.f32.partialorder %v4026_v10, 0.0 }
 0xa6f   : > { %v2041_v55 = vpop.permute.xlu1 %2040  ;;  %v2075_v42 = vpop.permute.xlu0 %2074  ;;  %v2148_v24 = vmul.f32 %v2814_v62, %v4010_v0 }
 0xa70   : > { %v2098_v8 = vadd.f32 %v2075_v42, %v3951_v30  ;;  %v4036_v30 = vmax.f32 %v2056_v26, 1e-12  ;;  %v2057_v14 = vsub.f32 %v2009_v47, %v2041_v55  ;;  %2823 = vrsqrt.f32 %v4031_v44 }
 0xa71   : > { %v2150_v19 = vsel %vm2149_vm4, %v4010_v0, %v2148_v24  ;;  %vm2184_vm14 = vcmp.eq.f32.partialorder %v4031_v44, inf  ;;  %v2187_v58 = vand.u32 2147483648, %v4031_v44  ;;  %vm2186_vm0 = vcmp.eq.f32.partialorder %v4031_v44, 0.0 }
 0xa72   : > { %2114 = vrot.lane.b32.xlu0 %v2098_v8, %s2966_s11  ;;  %2825 = vrsqrt.f32 %v4036_v30  ;;  %v2816_v9 = vpop.eup %2815  ;;  %vm2191_vm15 = vcmp.eq.f32.partialorder %v4036_v30, inf  ;;  %vm2193_vm1 = vcmp.eq.f32.partialorder %v4036_v30, 0.0  ;;  %vm2138_vm4 = vcmask 7168  }
 0xa73   : > { %v2077_v45 = vpop.permute.xlu1 %2076  ;;  %v2079_v48 = vpop.permute.xlu0 %2078  ;;  %v2155_v52 = vmul.f32 %v2816_v9, %v4014_v46 }
 0xa74   : > { %v2099_v61 = vadd.f32 %v2077_v45, %v3955_v33  ;;  %v2100_v37 = vadd.f32 %v2079_v48, %v3953_v32  ;;  %v4044_v32 = vmax.f32 %v2057_v14, 1e-12  ;;  %v2818_v28 = vpop.eup %2817 }
 0xa75   : > { %v2162_v35 = vmul.f32 %v2818_v28, %v4017_v12  ;;  %v2157_v36 = vsel %vm2156_vm6, %v4014_v46, %v2155_v52 }
 0xa76   : > { %2116 = vrot.lane.b32.xlu1 %v2099_v61, %s2966_s11  ;;  %2118 = vrot.lane.b32.xlu0 %v2100_v37, %s2966_s11  ;;  %2827 = vrsqrt.f32 %v4044_v32  ;;  %v2160_v38 = vsel %vm2158_vm8, %v2159_v56, %v2157_v36  ;;  %vm2198_vm2 = vcmp.eq.f32.partialorder %v4044_v32, inf  ;;  %v2201_v55 = vand.u32 2147483648, %v4044_v32 }
 0xa77   : > { %v2081_v4 = vpop.permute.xlu1 %2080  ;;  %v2083_v5 = vpop.permute.xlu0 %2082  ;;  %v2164_v59 = vsel %vm2163_vm7, %v4017_v12, %v2162_v35  ;;  %v2194_v12 = vand.u32 2147483648, %v4036_v30  ;;  %vm2200_vm3 = vcmp.eq.f32.partialorder %v4044_v32, 0.0 }
 0xa78   : > { %v2101_v57 = vadd.f32 %v2081_v4, %v3958_v34  ;;  %v2102_v33 = vadd.f32 %v2083_v5, %v3963_v3  ;;  %v2820_v3 = vpop.eup %2819  ;;  %v2167_v6 = vsel %vm2165_vm9, %v2166_v2, %v2164_v59 }
 0xa79   : > { %v2822_v40 = vpop.eup %2821  ;;  %v2169_v20 = vmul.f32 %v2820_v3, %v4022_v50 }
 0xa7a   : > { %2120 = vrot.lane.b32.xlu1 %v2101_v57, %s2966_s11  ;;  %2122 = vrot.lane.b32.xlu0 %v2102_v33, %s2966_s11  ;;  %v2824_v11 = vpop.eup %2823 }
 0xa7b   : > { %v2085_v63 = vpop.permute.xlu1 %2084  ;;  %v2087_v18 = vpop.permute.xlu0 %2086  ;;  %v2171_v41 = vsel %vm2170_vm10, %v4022_v50, %v2169_v20  ;;  %v2183_v1 = vmul.f32 %v2824_v11, %v4031_v44 }
 0xa7c   : > { %v2103_v31 = vadd.f32 %v2085_v63, %v3965_v53  ;;  %v2104_v34 = vadd.f32 %v2087_v18, %v3969_v13  ;;  %v2152_v53 = vand.u32 2147483648, %v4010_v0  ;;  %v2826_v21 = vpop.eup %2825  ;;  %v2173_v0 = vand.u32 2147483648, %v4022_v50 }
 0xa7d   : > { %v2190_v29 = vmul.f32 %v2826_v21, %v4036_v30  ;;  %v2185_v22 = vsel %vm2184_vm14, %v4031_v44, %v2183_v1 }
 0xa7e   : > { %2124 = vrot.lane.b32.xlu1 %v2103_v31, %s2966_s11  ;;  %2126 = vrot.lane.b32.xlu0 %v2104_v34, %s2966_s11  ;;  %v2153_v39 = vsel %vm2151_vm5, %v2152_v53, %v2150_v19  ;;  %v2174_v7 = vsel %vm2172_vm12, %v2173_v0, %v2171_v41  ;;  %v2188_v16 = vsel %vm2186_vm0, %v2187_v58, %v2185_v22 }
 0xa7f   : > { %v2089_v51 = vpop.permute.xlu1 %2088  ;;  %v2192_v25 = vsel %vm2191_vm15, %v4036_v30, %v2190_v29 }
 0xa80   : > { %v2105_v13 = vadd.f32 %v2089_v51, %v3971_v15  ;;  %v2176_v15 = vmul.f32 %v2822_v40, %v4026_v10  ;;  %v2828_v60 = vpop.eup %2827  ;;  %v2195_v27 = vsel %vm2193_vm1, %v2194_v12, %v2192_v25 }
 0xa81   : > { %v2197_v46 = vmul.f32 %v2828_v60, %v4044_v32 }
 0xa82   : > { %2128 = vrot.lane.b32.xlu1 %v2105_v13, %s2966_s11  ;;  %2211 = vrot.lane.b32.xlu0 %v2153_v39, %s2967_s10  ;;  %v2178_v49 = vsel %vm2177_vm11, %v4026_v10, %v2176_v15 }
 0xa83   : > { %v2181_v23 = vsel %vm2179_vm13, %v2180_v17, %v2178_v49  ;;  %v2199_v43 = vsel %vm2198_vm2, %v4044_v32, %v2197_v46 }
 0xa84   : > { %v2202_v42 = vsel %vm2200_vm3, %v2201_v55, %v2199_v43 }
 0xa86   : > { %2213 = vrot.lane.b32.xlu1 %v2160_v38, %s2967_s10  ;;  %2215 = vrot.lane.b32.xlu0 %v2167_v6, %s2967_s10 }
 0xa8a   : > { %2217 = vrot.lane.b32.xlu1 %v2174_v7, %s2967_s10  ;;  %2219 = vrot.lane.b32.xlu0 %v2181_v23, %s2967_s10 }
 0xa8e   : > { %2221 = vrot.lane.b32.xlu1 %v2188_v16, %s2967_s10  ;;  %2223 = vrot.lane.b32.xlu0 %v2195_v27, %s2967_s10 }
 0xa92   : > { %2225 = vrot.lane.b32.xlu1 %v2202_v42, %s2967_s10 }
 0xae4   : > { %v2115_v50 = vpop.permute.xlu0 %2114 }
 0xae5   : > { %2139 = vst.msk [vmem:[%s3164_s7] sm:$0xff] %vm2138_vm4, %v2115_v50 }
 0xae8   : > { %v2117_v54 = vpop.permute.xlu1 %2116  ;;  %v2119_v8 = vpop.permute.xlu0 %2118 }
 0xae9   : > { %2140 = vst.msk [vmem:[%s3164_s7 + $0x8] sm:$0xff] %vm2138_vm4, %v2117_v54  ;;  %2141 = vst.msk [vmem:[%s3164_s7 + $0x10] sm:$0xff] %vm2138_vm4, %v2119_v8 }
 0xaec   : > { %v2121_v10 = vpop.permute.xlu1 %2120  ;;  %v2123_v26 = vpop.permute.xlu0 %2122 }
 0xaed   : > { %2142 = vst.msk [vmem:[%s3164_s7 + $0x18] sm:$0xff] %vm2138_vm4, %v2121_v10  ;;  %2143 = vst.msk [vmem:[%s3164_s7 + $0x20] sm:$0xff] %vm2138_vm4, %v2123_v26 }
 0xaf0   : > { %v2125_v47 = vpop.permute.xlu1 %2124  ;;  %v2127_v45 = vpop.permute.xlu0 %2126 }
 0xaf1   : > { %2144 = vst.msk [vmem:[%s3164_s7 + $0x28] sm:$0xff] %vm2138_vm4, %v2125_v47  ;;  %2145 = vst.msk [vmem:[%s3164_s7 + $0x30] sm:$0xff] %vm2138_vm4, %v2127_v45 }
 0xaf4   : > { %v2129_v48 = vpop.permute.xlu1 %2128  ;;  %v2212_v44 = vpop.permute.xlu0 %2211 }
 0xaf5   : > { %2146 = vst.msk [vmem:[%s3164_s7 + $0x38] sm:$0xff] %vm2138_vm4, %v2129_v48  ;;  %2235 = vst.msk [vmem:[%s3164_s7 + $0x40] sm:$0xff] %vm2138_vm4, %v2212_v44 }
 0xaf8   : > { %v2214_v61 = vpop.permute.xlu1 %2213  ;;  %v2216_v37 = vpop.permute.xlu0 %2215 }
 0xaf9   : > { %2236 = vst.msk [vmem:[%s3164_s7 + $0x48] sm:$0xff] %vm2138_vm4, %v2214_v61  ;;  %2237 = vst.msk [vmem:[%s3164_s7 + $0x50] sm:$0xff] %vm2138_vm4, %v2216_v37 }
 0xafc   : > { %v2218_v30 = vpop.permute.xlu1 %2217  ;;  %v2220_v14 = vpop.permute.xlu0 %2219 }
 0xafd   : > { %2238 = vst.msk [vmem:[%s3164_s7 + $0x58] sm:$0xff] %vm2138_vm4, %v2218_v30  ;;  %2239 = vst.msk [vmem:[%s3164_s7 + $0x60] sm:$0xff] %vm2138_vm4, %v2220_v14 }
 0xb00   : > { %v2222_v62 = vpop.permute.xlu1 %2221  ;;  %v2224_v4 = vpop.permute.xlu0 %2223 }
 0xb01   : > { %2240 = vst.msk [vmem:[%s3164_s7 + $0x68] sm:$0xff] %vm2138_vm4, %v2222_v62  ;;  %2241 = vst.msk [vmem:[%s3164_s7 + $0x70] sm:$0xff] %vm2138_vm4, %v2224_v4 }
 0xb04   : > { %v2226_v5 = vpop.permute.xlu1 %2225 }
 0xb05   : > { %2242 = vst.msk [vmem:[%s3164_s7 + $0x78] sm:$0xff] %vm2138_vm4, %v2226_v5 }
 0xb06 PF: > { %s21_s14 = sadd.s32 1, %s2941_s14   ;;  %s4199_s23 = smov %s3099_s27 }
 0xb07   : > { %p18_p5 = scmp.ge.s32.totalorder %s21_s14, 14   ;;  %s4200_s30 = sld [smem:[#allocation9_spill]] }
 0xb08   : > { %s4201_s9 = sld [smem:[#allocation10_spill]]  ;;  %s4202_s11 = sld [smem:[#allocation11_spill]] }
 0xb09   : > { %s4203_s12 = sld [smem:[#allocation12_spill]]  ;;  %s4204_s21 = sld [smem:[#allocation13_spill]] }
 0xb0a   : > { %s4205_s27 = smov %s2909_s28  ;;  %s4206_s28 = smov %s2913_s29 }
 0xb0b   : > { %s4207_s29 = smov %s4199_s23  ;;  %s4208_s10 = smov %s2937_s13 }
 0xb0c   :  { %20 = sbr.rel (!%p18_p5) target bundleno = 10 (0xa), region = 116 }
 0xb0f   : > { %s4209_s13 = smov %s4204_s21 }
 0xb13   :  { %2264 = vsyncpa [#allocation7], 1 }
 0xb14   :  { %2266 = vsyncpa [#allocation7 + $0x1], 1 }

</bundles_post_ra>
